<compile_context>
chip_gen: v6e
topology: v6e:2x2x1
jax: 0.10.0
libtpu: 0.0.40
codegen_flags: <defaults>
</compile_context>

<pallas_src>
import jax
import jax.numpy as jnp
from jax.experimental import pallas as pl
from jax.experimental.pallas import tpu as pltpu


K_IN = 3072 + 10      # 3082 real input features (flattened CIFAR + one-hot desc)
K_PAD = 3200          # 25 * 128 -> lane-aligned padded input width
N1, N2, N3 = 1024, 512, 128
N_OUT = 2             # real number of classes
N_PAD = 128           # lane-dense padded logits width
NEG_BIG = -1e30       # bias of padded classes -> softmax probability exactly 0
TN1 = 128             # layer-1 output-feature tile width (grid axis)
NT1 = N1 // TN1       # 8 grid steps


def _fused_mlp_kernel(x_ref, w1_ref, s1_ref, b1_ref, w2_ref, b2_ref,
                      w3_ref, b3_ref, w4_ref, b4_ref, o_ref, acc2_ref):
    """Per grid step j:
         h1_j   = relu((x @ dequant(w1[:, j*128:(j+1)*128])) + b1_j)   (B, 128)
         acc2  += h1_j @ w2[j*128:(j+1)*128, :]                        (B, 512)
       Last step: bias2 + relu, layer 3, layer 4 (padded to 128), softmax.
    """
    j = pl.program_id(0)
    cdt = w2_ref.dtype  # bf16 compute dtype for MXU inputs

    @pl.when(j == 0)
    def _():
        acc2_ref[...] = jnp.zeros_like(acc2_ref)

    # ---- layer 1, column tile j (int8 weights -> bf16, scale applied after) ----
    w1_tile = w1_ref[...].astype(cdt)                       # (K_PAD, 128) bf16
    h1 = jnp.dot(x_ref[...], w1_tile, preferred_element_type=jnp.float32)
    h1 = jnp.maximum(h1 * s1_ref[...] + b1_ref[...], 0.0)   # (B, 128) f32

    # ---- layer 2 partial product for this tile ----
    acc2_ref[...] += jnp.dot(h1.astype(cdt), w2_ref[...],
                             preferred_element_type=jnp.float32)

    # ---- epilogue: finish layer 2, layers 3/4, softmax ----
    @pl.when(j == pl.num_programs(0) - 1)
    def _():
        h2 = jnp.maximum(acc2_ref[...] + b2_ref[...], 0.0)            # (B, 512)
        h3 = jnp.dot(h2.astype(cdt), w3_ref[...],
                     preferred_element_type=jnp.float32)
        h3 = jnp.maximum(h3 + b3_ref[...], 0.0)                       # (B, 128)
        logits = jnp.dot(h3.astype(cdt), w4_ref[...],
                         preferred_element_type=jnp.float32) + b4_ref[...]
        # Padded logit columns carry bias = NEG_BIG (f32), so exp underflows to 0
        # and the 128-wide softmax equals the softmax over the 2 real classes.
        m = jnp.max(logits, axis=-1, keepdims=True)
        e = jnp.exp(logits - m)
        inv = pl.reciprocal(jnp.sum(e, axis=-1, keepdims=True), approx=True)
        o_ref[...] = (e * inv).astype(o_ref.dtype)


def fused_mlp(x, params):
    """x: (B, K_PAD) bf16. Returns padded softmax probs (B, N_PAD) f32."""
    (w1q, s1, b1), (w2, b2), (w3, b3), (w4, b4) = params
    B = x.shape[0]

    def full(shape):
        return pl.BlockSpec(shape, lambda j: (0,) * len(shape))

    return pl.pallas_call(
        _fused_mlp_kernel,
        out_shape=jax.ShapeDtypeStruct((B, N_PAD), jnp.float32),
        grid_spec=pltpu.PrefetchScalarGridSpec(
            num_scalar_prefetch=0,
            grid=(NT1,),
            in_specs=[
                full(x.shape),                                  # x: resident
                pl.BlockSpec((K_PAD, TN1), lambda j: (0, j)),   # w1 int8 column tile
                pl.BlockSpec((1, TN1), lambda j: (0, j)),       # per-column scale tile
                pl.BlockSpec((1, TN1), lambda j: (0, j)),       # b1 tile
                pl.BlockSpec((TN1, N2), lambda j: (j, 0)),      # w2 row tile
                full(b2.shape),
                full(w3.shape), full(b3.shape),
                full(w4.shape), full(b4.shape),
            ],
            out_specs=full((B, N_PAD)),
            scratch_shapes=[pltpu.VMEM((B, N2), jnp.float32)],  # layer-2 accumulator
        ),
        compiler_params=pltpu.CompilerParams(
            # Grid axis is a layer-2 reduction (accumulator) -> arbitrary.
            dimension_semantics=("arbitrary",),
            # Actual footprint at B=8 is ~1.6 MB; 16 MiB leaves batch headroom
            # and fits every chip's default scoped budget.
            vmem_limit_bytes=16 * 1024 * 1024,
        ),
    )(x, w1q, s1, b1, w2, b2, w3, b3, w4, b4)


# ----------------------------------------------------------------------------
# Parameter construction (deterministic, mimics nn.Linear's uniform init).
# Padding, int8 quantization of w1 and bf16 casting happen ONCE here.
# ----------------------------------------------------------------------------
def init_params(key):
    k1, k2, k3, k4 = jax.random.split(key, 4)

    def linear(k, fan_in, fan_out):
        kw, kb = jax.random.split(k)
        bound = 1.0 / jnp.sqrt(jnp.float32(fan_in))
        # stored as (in, out)  ==  torch weight (out, in) transposed
        w = jax.random.uniform(kw, (fan_in, fan_out), jnp.float32, -bound, bound)
        b = jax.random.uniform(kb, (1, fan_out), jnp.float32, -bound, bound)
        return w, b

    w1, b1 = linear(k1, K_IN, N1)
    w2, b2 = linear(k2, N1, N2)
    w3, b3 = linear(k3, N2, N3)
    w4, b4 = linear(k4, N3, N_OUT)

    # zero-pad w1 rows to the lane-aligned input width (matmul no-op), then
    # quantize to int8 with a per-output-column f32 scale.
    w1p = jnp.pad(w1, ((0, K_PAD - K_IN), (0, 0)))
    amax = jnp.max(jnp.abs(w1p), axis=0, keepdims=True)            # (1, N1)
    s1 = (jnp.maximum(amax, 1e-12) / 127.0).astype(jnp.float32)
    w1q = jnp.clip(jnp.round(w1p / s1), -127, 127).astype(jnp.int8)

    # pad layer-4 to a lane-dense 128-wide output; padded classes get zero
    # weight columns and bias NEG_BIG -> softmax probability exactly 0.
    w4p = jnp.pad(w4, ((0, 0), (0, N_PAD - N_OUT)))
    b4p = jnp.pad(b4, ((0, 0), (0, N_PAD - N_OUT)), constant_values=NEG_BIG)

    bf16 = lambda w: w.astype(jnp.bfloat16)
    return ((w1q, s1, b1), (bf16(w2), b2), (bf16(w3), b3), (bf16(w4p), b4p))


@jax.jit
def simple_model_forward(params, state, desc):
    """Pallas implementation of SimpleModel.forward."""
    B = state.shape[0]
    # ---- plain-JAX glue: reshape / one-hot / concat / pad / cast ----
    state2d = jnp.reshape(state, (B, 3072)).astype(jnp.float32)
    desc_oh = jax.nn.one_hot(desc, 10, dtype=jnp.float32)
    x = jnp.concatenate([state2d, desc_oh], axis=1)        # (B, 3082)
    x = jnp.pad(x, ((0, 0), (0, K_PAD - K_IN)))            # (B, 3200)
    x = x.astype(jnp.bfloat16)

    # ---- single fused Pallas kernel: 4 x (matmul+bias) + ReLUs + softmax ----
    probs_padded = fused_mlp(x, params)                    # (B, 128)
    return probs_padded[:, :N_OUT]                         # (B, 2)


def _reference_forward(params, state, desc):
    """Pure-JAX f32 reference using the SAME (dequantized) weights."""
    (w1q, s1, b1), (w2, b2), (w3, b3), (w4, b4) = params
    B = state.shape[0]
    state2d = jnp.reshape(state, (B, 3072)).astype(jnp.float32)
    desc_oh = jax.nn.one_hot(desc, 10, dtype=jnp.float32)
    x = jnp.concatenate([state2d, desc_oh], axis=1)
    w1 = (w1q.astype(jnp.float32) * s1)[:K_IN]             # dequant, drop row pad
    h = jax.nn.relu(x @ w1 + b1)
    h = jax.nn.relu(h @ w2.astype(jnp.float32) + b2)
    h = jax.nn.relu(h @ w3.astype(jnp.float32) + b3)
    logits = h @ w4.astype(jnp.float32)[:, :N_OUT] + b4[:, :N_OUT]
    return jax.nn.softmax(logits, axis=1)


if __name__ == "__main__":
    key = jax.random.PRNGKey(0)
    k_state, k_desc, k_params = jax.random.split(key, 3)

    B = 8
    # CIFAR-like NCHW input: (B, 3, 32, 32) -> flattened to 3072 features
    state = jax.random.normal(k_state, (B, 3, 32, 32), dtype=jnp.float32)
    desc = jax.random.randint(k_desc, (B,), 0, 10, dtype=jnp.int32)

    params = init_params(k_params)

    out = simple_model_forward(params, state, desc)
    out = jax.block_until_ready(out)

    assert out.shape == (B, 2)
    # softmax rows must sum to ~1 (approx reciprocal) and be non-negative
    assert bool(jnp.all(jnp.abs(jnp.sum(out, axis=1) - 1.0) < 5e-3))
    assert bool(jnp.all(out >= 0.0))
    # bf16-matmul kernel vs f32 reference with the same dequantized weights
    ref = _reference_forward(params, state, desc)
    assert bool(jnp.all(jnp.abs(out - ref) < 5e-2))
    print("KERNEL_OK")
</pallas_src>

<mosaic_0001>
module attributes {stable_mosaic.version = 11 : i64} {
  func.func @_fused_mlp_kernel(%arg0: i32, %arg1: memref<8x3200xbf16, #tpu.memory_space<vmem>>, %arg2: memref<3200x128xi8, #tpu.memory_space<vmem>>, %arg3: memref<1x128xf32, #tpu.memory_space<vmem>>, %arg4: memref<1x128xf32, #tpu.memory_space<vmem>>, %arg5: memref<128x512xbf16, #tpu.memory_space<vmem>>, %arg6: memref<1x512xf32, #tpu.memory_space<vmem>>, %arg7: memref<512x128xbf16, #tpu.memory_space<vmem>>, %arg8: memref<1x128xf32, #tpu.memory_space<vmem>>, %arg9: memref<128x128xbf16, #tpu.memory_space<vmem>>, %arg10: memref<1x128xf32, #tpu.memory_space<vmem>>, %arg11: memref<8x128xf32, #tpu.memory_space<vmem>>, %arg12: memref<8x512xf32, #tpu.memory_space<vmem>>) attributes {dimension_semantics = [#tpu.dimension_semantics<arbitrary>], iteration_bounds = array<i64: 8>, scalar_prefetch = 0 : i64, scratch_operands = 1 : i64, tpu.core_type = #tpu.core_type<tc>, window_params = [{pipeline_mode = #tpu.pipeline_mode<synchronous>, transform_indices = @transform_0, window_bounds = array<i64: 8, 3200>}, {transform_indices = @transform_1, window_bounds = array<i64: 3200, 128>}, {transform_indices = @transform_2, window_bounds = array<i64: 1, 128>}, {transform_indices = @transform_3, window_bounds = array<i64: 1, 128>}, {transform_indices = @transform_4, window_bounds = array<i64: 128, 512>}, {pipeline_mode = #tpu.pipeline_mode<synchronous>, transform_indices = @transform_5, window_bounds = array<i64: 1, 512>}, {pipeline_mode = #tpu.pipeline_mode<synchronous>, transform_indices = @transform_6, window_bounds = array<i64: 512, 128>}, {pipeline_mode = #tpu.pipeline_mode<synchronous>, transform_indices = @transform_7, window_bounds = array<i64: 1, 128>}, {pipeline_mode = #tpu.pipeline_mode<synchronous>, transform_indices = @transform_8, window_bounds = array<i64: 128, 128>}, {pipeline_mode = #tpu.pipeline_mode<synchronous>, transform_indices = @transform_9, window_bounds = array<i64: 1, 128>}, {pipeline_mode = #tpu.pipeline_mode<synchronous>, transform_indices = @transform_10, window_bounds = array<i64: 8, 128>}]} {
    %c0_i32 = arith.constant 0 : i32
    %0 = arith.cmpi eq, %arg0, %c0_i32 : i32
    %1 = arith.extui %0 : i1 to i32
    %c0_i32_0 = arith.constant 0 : i32
    %2 = arith.cmpi ne, %1, %c0_i32_0 : i32
    scf.if %2 {
      %cst_17 = arith.constant 0.000000e+00 : f32
      %24 = vector.broadcast %cst_17 : f32 to vector<8x512xf32>
      %c0_18 = arith.constant 0 : index
      %c0_19 = arith.constant 0 : index
      %25 = vector.load %arg12[%c0_18, %c0_19] : memref<8x512xf32, #tpu.memory_space<vmem>>, vector<8x512xf32>
      tpu.vector_store %arg12[%c0_18, %c0_19], %24 {strides = array<i32>} : memref<8x512xf32, #tpu.memory_space<vmem>>, vector<8x512xf32>,
    } else {
    }
    %c0 = arith.constant 0 : index
    %c0_1 = arith.constant 0 : index
    %3 = vector.load %arg2[%c0, %c0_1] : memref<3200x128xi8, #tpu.memory_space<vmem>>, vector<3200x128xi8>
    %4 = arith.sitofp %3 : vector<3200x128xi8> to vector<3200x128xbf16>
    %c0_2 = arith.constant 0 : index
    %c0_3 = arith.constant 0 : index
    %5 = vector.load %arg1[%c0_2, %c0_3] : memref<8x3200xbf16, #tpu.memory_space<vmem>>, vector<8x3200xbf16>
    %cst = arith.constant dense<0.000000e+00> : vector<8x128xf32>
    %6 = tpu.matmul %5, %4, %cst {dimension_numbers = #tpu.dot_dimension_numbers<[1], [0], [0], [1], [0, 0, 1, 1], [], []>} : vector<8x3200xbf16>, vector<3200x128xbf16>, vector<8x128xf32> -> vector<8x128xf32>
    %c0_4 = arith.constant 0 : index
    %c0_5 = arith.constant 0 : index
    %7 = vector.load %arg3[%c0_4, %c0_5] : memref<1x128xf32, #tpu.memory_space<vmem>>, vector<1x128xf32>
    %8 = vector.broadcast %7 : vector<1x128xf32> to vector<8x128xf32>
    %9 = arith.mulf %6, %8 : vector<8x128xf32>
    %c0_6 = arith.constant 0 : index
    %c0_7 = arith.constant 0 : index
    %10 = vector.load %arg4[%c0_6, %c0_7] : memref<1x128xf32, #tpu.memory_space<vmem>>, vector<1x128xf32>
    %11 = vector.broadcast %10 : vector<1x128xf32> to vector<8x128xf32>
    %12 = arith.addf %9, %11 : vector<8x128xf32>
    %cst_8 = arith.constant 0.000000e+00 : f32
    %13 = vector.broadcast %cst_8 : f32 to vector<8x128xf32>
    %14 = arith.maximumf %12, %13 : vector<8x128xf32>
    %c0_9 = arith.constant 0 : index
    %c0_10 = arith.constant 0 : index
    %15 = vector.load %arg12[%c0_9, %c0_10] : memref<8x512xf32, #tpu.memory_space<vmem>>, vector<8x512xf32>
    %16 = arith.truncf %14 : vector<8x128xf32> to vector<8x128xbf16>
    %c0_11 = arith.constant 0 : index
    %c0_12 = arith.constant 0 : index
    %17 = vector.load %arg5[%c0_11, %c0_12] : memref<128x512xbf16, #tpu.memory_space<vmem>>, vector<128x512xbf16>
    %cst_13 = arith.constant dense<0.000000e+00> : vector<8x512xf32>
    %18 = tpu.matmul %16, %17, %cst_13 {dimension_numbers = #tpu.dot_dimension_numbers<[1], [0], [0], [1], [0, 0, 1, 1], [], []>} : vector<8x128xbf16>, vector<128x512xbf16>, vector<8x512xf32> -> vector<8x512xf32>
    %19 = arith.addf %15, %18 : vector<8x512xf32>
    %c0_14 = arith.constant 0 : index
    %c0_15 = arith.constant 0 : index
    %20 = vector.load %arg12[%c0_14, %c0_15] : memref<8x512xf32, #tpu.memory_space<vmem>>, vector<8x512xf32>
    tpu.vector_store %arg12[%c0_14, %c0_15], %19 {strides = array<i32>} : memref<8x512xf32, #tpu.memory_space<vmem>>, vector<8x512xf32>,
    %c7_i32 = arith.constant 7 : i32
    %21 = arith.cmpi eq, %arg0, %c7_i32 : i32
    %22 = arith.extui %21 : i1 to i32
    %c0_i32_16 = arith.constant 0 : i32
    %23 = arith.cmpi ne, %22, %c0_i32_16 : i32
    scf.if %23 {
      %c0_17 = arith.constant 0 : index
      %c0_18 = arith.constant 0 : index
      %24 = vector.load %arg12[%c0_17, %c0_18] : memref<8x512xf32, #tpu.memory_space<vmem>>, vector<8x512xf32>
      %c0_19 = arith.constant 0 : index
      %c0_20 = arith.constant 0 : index
      %25 = vector.load %arg6[%c0_19, %c0_20] : memref<1x512xf32, #tpu.memory_space<vmem>>, vector<1x512xf32>
      %26 = vector.broadcast %25 : vector<1x512xf32> to vector<8x512xf32>
      %27 = arith.addf %24, %26 : vector<8x512xf32>
      %cst_21 = arith.constant 0.000000e+00 : f32
      %28 = vector.broadcast %cst_21 : f32 to vector<8x512xf32>
      %29 = arith.maximumf %27, %28 : vector<8x512xf32>
      %30 = arith.truncf %29 : vector<8x512xf32> to vector<8x512xbf16>
      %c0_22 = arith.constant 0 : index
      %c0_23 = arith.constant 0 : index
      %31 = vector.load %arg7[%c0_22, %c0_23] : memref<512x128xbf16, #tpu.memory_space<vmem>>, vector<512x128xbf16>
      %cst_24 = arith.constant dense<0.000000e+00> : vector<8x128xf32>
      %32 = tpu.matmul %30, %31, %cst_24 {dimension_numbers = #tpu.dot_dimension_numbers<[1], [0], [0], [1], [0, 0, 1, 1], [], []>} : vector<8x512xbf16>, vector<512x128xbf16>, vector<8x128xf32> -> vector<8x128xf32>
      %c0_25 = arith.constant 0 : index
      %c0_26 = arith.constant 0 : index
      %33 = vector.load %arg8[%c0_25, %c0_26] : memref<1x128xf32, #tpu.memory_space<vmem>>, vector<1x128xf32>
      %34 = vector.broadcast %33 : vector<1x128xf32> to vector<8x128xf32>
      %35 = arith.addf %32, %34 : vector<8x128xf32>
      %cst_27 = arith.constant 0.000000e+00 : f32
      %36 = vector.broadcast %cst_27 : f32 to vector<8x128xf32>
      %37 = arith.maximumf %35, %36 : vector<8x128xf32>
      %38 = arith.truncf %37 : vector<8x128xf32> to vector<8x128xbf16>
      %c0_28 = arith.constant 0 : index
      %c0_29 = arith.constant 0 : index
      %39 = vector.load %arg9[%c0_28, %c0_29] : memref<128x128xbf16, #tpu.memory_space<vmem>>, vector<128x128xbf16>
      %cst_30 = arith.constant dense<0.000000e+00> : vector<8x128xf32>
      %40 = tpu.matmul %38, %39, %cst_30 {dimension_numbers = #tpu.dot_dimension_numbers<[1], [0], [0], [1], [0, 0, 1, 1], [], []>} : vector<8x128xbf16>, vector<128x128xbf16>, vector<8x128xf32> -> vector<8x128xf32>
      %c0_31 = arith.constant 0 : index
      %c0_32 = arith.constant 0 : index
      %41 = vector.load %arg10[%c0_31, %c0_32] : memref<1x128xf32, #tpu.memory_space<vmem>>, vector<1x128xf32>
      %42 = vector.broadcast %41 : vector<1x128xf32> to vector<8x128xf32>
      %43 = arith.addf %40, %42 : vector<8x128xf32>
      %cst_33 = arith.constant dense<0xFF800000> : vector<8xf32>
      %44 = vector.multi_reduction <maximumf>, %43, %cst_33 [1] : vector<8x128xf32> to vector<8xf32>
      %45 = vector.shape_cast %44 : vector<8xf32> to vector<8x1xf32>
      %46 = vector.broadcast %45 : vector<8x1xf32> to vector<8x128xf32>
      %47 = arith.subf %43, %46 : vector<8x128xf32>
      %48 = math.exp %47 : vector<8x128xf32>
      %cst_34 = arith.constant dense<0.000000e+00> : vector<8xf32>
      %49 = vector.multi_reduction <add>, %48, %cst_34 [1] : vector<8x128xf32> to vector<8xf32>
      %50 = vector.shape_cast %49 : vector<8xf32> to vector<8x1xf32>
      %51 = tpu.reciprocal %50 {approx = true} : vector<8x1xf32> -> vector<8x1xf32>
      %52 = vector.broadcast %51 : vector<8x1xf32> to vector<8x128xf32>
      %53 = arith.mulf %48, %52 : vector<8x128xf32>
      %c0_35 = arith.constant 0 : index
      %c0_36 = arith.constant 0 : index
      %54 = vector.load %arg11[%c0_35, %c0_36] : memref<8x128xf32, #tpu.memory_space<vmem>>, vector<8x128xf32>
      tpu.vector_store %arg11[%c0_35, %c0_36], %53 {strides = array<i32>} : memref<8x128xf32, #tpu.memory_space<vmem>>, vector<8x128xf32>,
    } else {
    }
    return
  }
  func.func @transform_0(%arg0: i32) -> (i32, i32) {
    %c0_i32 = arith.constant 0 : i32
    %c0_i32_0 = arith.constant 0 : i32
    %c0_i32_1 = arith.constant 0 : i32
    return %c0_i32, %c0_i32_0 : i32, i32
  }
  func.func @transform_1(%arg0: i32) -> (i32, i32) {
    %c0_i32 = arith.constant 0 : i32
    %c0_i32_0 = arith.constant 0 : i32
    return %c0_i32, %arg0 : i32, i32
  }
  func.func @transform_2(%arg0: i32) -> (i32, i32) {
    %c0_i32 = arith.constant 0 : i32
    %c0_i32_0 = arith.constant 0 : i32
    return %c0_i32, %arg0 : i32, i32
  }
  func.func @transform_3(%arg0: i32) -> (i32, i32) {
    %c0_i32 = arith.constant 0 : i32
    %c0_i32_0 = arith.constant 0 : i32
    return %c0_i32, %arg0 : i32, i32
  }
  func.func @transform_4(%arg0: i32) -> (i32, i32) {
    %c0_i32 = arith.constant 0 : i32
    %c0_i32_0 = arith.constant 0 : i32
    return %arg0, %c0_i32 : i32, i32
  }
  func.func @transform_5(%arg0: i32) -> (i32, i32) {
    %c0_i32 = arith.constant 0 : i32
    %c0_i32_0 = arith.constant 0 : i32
    %c0_i32_1 = arith.constant 0 : i32
    return %c0_i32, %c0_i32_0 : i32, i32
  }
  func.func @transform_6(%arg0: i32) -> (i32, i32) {
    %c0_i32 = arith.constant 0 : i32
    %c0_i32_0 = arith.constant 0 : i32
    %c0_i32_1 = arith.constant 0 : i32
    return %c0_i32, %c0_i32_0 : i32, i32
  }
  func.func @transform_7(%arg0: i32) -> (i32, i32) {
    %c0_i32 = arith.constant 0 : i32
    %c0_i32_0 = arith.constant 0 : i32
    %c0_i32_1 = arith.constant 0 : i32
    return %c0_i32, %c0_i32_0 : i32, i32
  }
  func.func @transform_8(%arg0: i32) -> (i32, i32) {
    %c0_i32 = arith.constant 0 : i32
    %c0_i32_0 = arith.constant 0 : i32
    %c0_i32_1 = arith.constant 0 : i32
    return %c0_i32, %c0_i32_0 : i32, i32
  }
  func.func @transform_9(%arg0: i32) -> (i32, i32) {
    %c0_i32 = arith.constant 0 : i32
    %c0_i32_0 = arith.constant 0 : i32
    %c0_i32_1 = arith.constant 0 : i32
    return %c0_i32, %c0_i32_0 : i32, i32
  }
  func.func @transform_10(%arg0: i32) -> (i32, i32) {
    %c0_i32 = arith.constant 0 : i32
    %c0_i32_0 = arith.constant 0 : i32
    %c0_i32_1 = arith.constant 0 : i32
    return %c0_i32, %c0_i32_0 : i32, i32
  }
}

</mosaic_0001>

<bundles_post_ra>
// kernel: simple_model_forward.1
= control target key start
LH: loop header
LB: loop body
LE: loop exit
PB: predicated region body
PF: predicated region fallthrough
CT: control target
= control target key end

     0   :  { %s4083_s0 = inlined_call_operand.vmem [shape: bf16[8,3200], index: 0, kind: input, shape index: {}]   ;;  %s4084_s1 = inlined_call_operand.hbm [shape: s8[3200,1024], index: 1, kind: input, shape index: {}]   ;;  %s4085_s2 = inlined_call_operand.hbm [shape: f32[1,1024], index: 2, kind: input, shape index: {}]   ;;  %s4086_s3 = inlined_call_operand.hbm [shape: f32[1,1024], index: 3, kind: input, shape index: {}]   ;;  %s4087_s4 = inlined_call_operand.hbm [shape: bf16[1024,512], index: 4, kind: input, shape index: {}]   ;;  %s4088_s5 = inlined_call_operand.hbm [shape: f32[1,512], index: 5, kind: input, shape index: {}]   ;;  %s4089_s6 = inlined_call_operand.hbm [shape: bf16[512,128], index: 6, kind: input, shape index: {}]   ;;  %s4090_s7 = inlined_call_operand.hbm [shape: f32[1,128], index: 7, kind: input, shape index: {}]   ;;  %s4091_s8 = inlined_call_operand.hbm [shape: bf16[128,128], index: 8, kind: input, shape index: {}]   ;;  %s4092_s9 = inlined_call_operand.hbm [shape: f32[1,128], index: 9, kind: input, shape index: {}]   ;;  %s4093_s10 = inlined_call_operand.vmem [shape: f32[8,128], index: 10, kind: output, shape index: {}]  }
   0x1   :  { %4106 = sst [smem:[#allocation26_spill]] %s4084_s1 }
   0x2   :  { %4107 = sst [smem:[#allocation27_spill]] %s4088_s5 }
   0x3   :  { %4108 = sst [smem:[#allocation28_spill]] %s4089_s6 }
   0x4   :  { %4109 = sst [smem:[#allocation29_spill]] %s4091_s8 }
   0x5   :  { %4110 = sst [smem:[#allocation30_spill]] %s4093_s10 }
   0x6   :  { %15 = vsyncpa [#allocation4], 0 }
   0x7   :  { %17 = vsyncpa [#allocation4 + $0x1], 0 }
   0x8   :  { %18 = vsyncpa [#allocation6], 0 }
   0x9   :  { %20 = vsyncpa [#allocation6 + $0x1], 0 }
   0xa   :  { %21 = vsyncpa [#allocation9], 0 }
   0xb   :  { %23 = vsyncpa [#allocation9 + $0x1], 0 }
   0xc   :  { %24 = vsyncpa [#allocation12], 0 }
   0xd   :  { %25 = vsyncpa [#allocation15], 0  ;;  %s3532_s13 = smov 0   ;;  %s3534_s14 = smov 0  }
   0xe   :  { %s3536_s15 = smov 0   ;;  %s3538_s16 = smov 0  }
   0xf LB: > { %4111 = sst [smem:[#allocation23_spill]] %s3449_s15  ;;  %s3455_s17 = smov [#allocation10]   ;;  %s3453_s16 = sphi %s3538_s16, %s4139_s16   ;;  %s3449_s15 = sphi %s3536_s15, %s4141_s15   ;;  %s3445_s14 = sphi %s3534_s14, %s4143_s14   ;;  %s3441_s13 = sphi %s3532_s13, %s4142_s13  }
  0x10   : > { %s303_s18 = sshll.u32 %s3455_s17, 4  ;;  %s3553_s19 = sadd.s32 4294967295, %s3453_s16   ;;  %s304_s18 = int_to_ptr.vmem [resolvable:$true] %s303_s18 }
  0x11   : > { %p2426_p0 = scmp.ge.s32.totalorder %s3453_s16, 1  ;;  %p4094_p1 = scmp.eq.s32.totalorder %s3553_s19, 0 }
  0x12   : > { %p287_p2 = scmp.lt.s32.totalorder %s3453_s16, 9  ;;  %s3456_s21 = smov [#allocation11]  }
  0x13   : > { %s313_s22 = sshll.u32 %s3456_s21, 4  ;;  %s3457_s24 = smov [#allocation14]   ;;  %s3565_s22 = int_to_ptr.vmem [resolvable:$true] %s313_s22 }
  0x14   : > { %p3559_p4 = pnand %p2426_p0, %p287_p2  ;;  %s337_s25 = sshll.u32 %s3457_s24, 4  ;;  %s3573_s25 = int_to_ptr.vmem [resolvable:$true] %s337_s25 }
  0x15   : > { %s3168_s27 = scalar_lea.vmem %s304_s18, 64  ;;  %p3176_p11 = scmp.lt.s32.totalorder %s304_s18, %s304_s18 }
  0x16   : > { %s4112_s20 = scalar_select %p3559_p4, 1, 0 }
  0x17   : > { %p2950_p5 = pneg %p3559_p4  ;;  %p3169_p8 = scmp.ne.s32.totalorder %s304_s18, %s3168_s27 }
  0x18   : > { %p3177_p12 = scmp.lt.s32.totalorder %s3168_s27, %s3168_s27 }
  0x19   : > { %p3569_p6 = pnand %p2950_p5, %p4094_p1 }
  0x1a   : > { %p3178_p13 = por %p3177_p12, %p3176_p11 }
  0x1b   : > { %s4113_s23 = scalar_select %p3569_p6, 1, 0 }
  0x1c   : > { %p3577_p7 = pneg %p3569_p6 }
  0x1e   : > { %s4114_s26 = scalar_select %p3577_p7, 1, 0 }
  0x1f   : > { %p3171_p9 = pnand %p3169_p8, %p3577_p7 }
  0x21   : > { %p3172_p10 = pneg %p3171_p9 }
  0x23   : > { %p3179_p0 = pnand %p3178_p13, %p3172_p10 }
  0x25   : > { %3182 = shalt.err (!%p3179_p0)
}
  0x26   : > { %s4115_s5 = sld [smem:[#allocation27_spill]]  ;;  %s3194_s30 = scalar_lea.vmem %s3565_s22, 4096 }
  0x27   : > { %p3195_p2 = scmp.ne.s32.totalorder %s3565_s22, %s3194_s30  ;;  %p3202_p9 = scmp.lt.s32.totalorder %s3565_s22, %s3565_s22 }
  0x28   : > { %p3203_p11 = scmp.lt.s32.totalorder %s3194_s30, %s3194_s30 }
  0x29   : > { %p3197_p5 = pnand %p3195_p2, %p3577_p7 }
  0x2a   : > { %p3204_p10 = por %p3203_p11, %p3202_p9 }
  0x2b   : > { %p3198_p8 = pneg %p3197_p5 }
  0x2c   : > { %2953 = dma.hbm_to_vmem [thread:$0]  (!%p3569_p6), %s4115_s5, 64, %s304_s18, [#allocation9]  }
  0x2d   : > { %p3205_p12 = pnand %p3204_p10, %p3198_p8 }
  0x2f   : > { %3208 = shalt.err (!%p3205_p12)
}
  0x30   : > { %s3458_s11 = smov 64   ;;  %s3459_s12 = smov 4  }
  0x31   : > { %s4116_s6 = sld [smem:[#allocation28_spill]]  ;;  %s3220_s21 = scalar_lea.vmem %s3573_s25, 1024 }
  0x32   : > { %p3221_p13 = scmp.ne.s32.totalorder %s3573_s25, %s3220_s21  ;;  %p3228_p5 = scmp.lt.s32.totalorder %s3573_s25, %s3573_s25 }
  0x33   : > { %p3229_p8 = scmp.lt.s32.totalorder %s3220_s21, %s3220_s21 }
  0x34   : > { %p3223_p0 = pnand %p3221_p13, %p3577_p7 }
  0x35   : > { %p3230_p9 = por %p3229_p8, %p3228_p5 }
  0x36   : > { %p3224_p2 = pneg %p3223_p0 }
  0x37   : > { %2956 = dma.hbm_to_vmem [thread:$0]  (!%p3569_p6), %s4116_s6, 4096, %s3565_s22, [#allocation12], %s3458_s11, %s3458_s11, %s3459_s12  }
  0x38   : > { %p3231_p11 = pnand %p3230_p9, %p3224_p2 }
  0x3a   : > { %3234 = shalt.err (!%p3231_p11)
}
  0x3b   : > { %s4117_s8 = sld [smem:[#allocation29_spill]]  ;;  %s3613_s22 = sadd.s32 1, %s3453_s16  }
  0x3c   : > { %4118 = sst [smem:[#allocation24_spill]] %s3613_s22  ;;  %s56_s28 = ssub.s32 %s3453_s16, %s3613_s22 }
  0x3d   : > { %s59_s29 = sadd.s32 1, %s3449_s15  ;;  %p57_p10 = scmp.eq.s32.totalorder %s56_s28, 0 }
  0x3e   : > { %p66_p12 = scmp.ne.s32.totalorder %s3449_s15, %s3445_s14  ;;  %p67_p13 = scmp.eq.s32.totalorder %s3453_s16, 0 }
  0x3f   : > { %p72_p0 = scmp.ne.s32.totalorder %s3445_s14, %s3441_s13  ;;  %p2984_p8 = scmp.lt.s32.totalorder %s3453_s16, 8 }
  0x40   : > { %s3624_s30 = scalar_select %p57_p10, %s3449_s15, %s59_s29  }
  0x41   : > { %2962 = dma.hbm_to_vmem [thread:$0]  (!%p3569_p6), %s4117_s8, 1024, %s3573_s25, [#allocation15], %s3458_s11, %s3458_s11, %s3459_s12  }
  0x42   : > { %4119 = sst [smem:[#allocation25_spill]] %s3624_s30  ;;  %p68_p2 = por %p67_p13, %p66_p12 }
  0x43   : > { %p3628_p5 = por %p4094_p1, %p72_p0  ;;  %s3634_s25 = sand.u32 1, %s3449_s15  }
  0x44   : > { %p3637_p9 = pnand %p2984_p8, %p68_p2  ;;  %s2434_s18 = sshll.u32 %s3453_s16, 4 }
  0x45   : > { %s4120_s17 = scalar_select %p3628_p5, 1, 0 }
  0x46   : > { %s4121_s12 = scalar_select %p3637_p9, 1, 0 }
  0x47   : > { %s385_s13 = scalar_lea.vmem [#allocation5], %s3634_s25  ;;  %s3646_s28 = scalar_lea.hbm %s4085_s2, %s2434_s18 }
  0x48   : > { %s392_s21 = sshll.u32 %s385_s13, 4  ;;  %s3651_s11 = scalar_lea.hbm %s4086_s3, %s2434_s18  ;;  %s393_s21 = int_to_ptr.vmem [resolvable:$true] %s392_s21 }
  0x49   : > { %s4122_s6 = sand.u32 1, %s3453_s16   ;;  %s3235_s30 = scalar_lea.hbm %s3646_s28, 16 }
  0x4a   : > { %s3655_s8 = scalar_lea.sflag [#allocation6], %s4122_s6  ;;  %p3236_p11 = scmp.ne.s32.totalorder %s3646_s28, %s3235_s30 }
  0x4b   : > { %p3661_p10 = pneg %p3637_p9  ;;  %s3240_s5 = scalar_lea.hbm %s4085_s2, 128 }
  0x4c   : > { %p3241_p0 = scmp.lt.s32.totalorder %s3646_s28, %s4085_s2  ;;  %p3242_p2 = scmp.lt.s32.totalorder %s3240_s5, %s3235_s30 }
  0x4d   : > { %p3238_p12 = pnand %p3661_p10, %p3236_p11 }
  0x4e   : > { %p3243_p8 = por %p3242_p2, %p3241_p0 }
  0x4f   : > { %p3239_p13 = pneg %p3238_p12 }
  0x51   : > { %p3244_p3 = pnand %p3243_p8, %p3239_p13 }
  0x53   : > { %3247 = shalt.err (!%p3244_p3)
}
  0x54   : > { %s3248_s6 = scalar_lea.vmem %s393_s21, 16  ;;  %s3460_s15 = smov [#allocation5]  }
  0x55   : > { %p3249_p1 = scmp.ne.s32.totalorder %s393_s21, %s3248_s6  ;;  %s3253_s22 = sshll.u32 %s3460_s15, 4  ;;  %s3254_s22 = int_to_ptr.vmem [resolvable:$false] %s3253_s22 }
  0x56   : > { %s3255_s10 = scalar_lea.vmem %s3254_s22, 32  ;;  %p3256_p11 = scmp.lt.s32.totalorder %s393_s21, %s3254_s22 }
  0x57   : > { %p3251_p5 = pnand %p3249_p1, %p3661_p10  ;;  %p3257_p12 = scmp.lt.s32.totalorder %s3255_s10, %s3248_s6 }
  0x59   : > { %p3252_p4 = pneg %p3251_p5  ;;  %p3258_p6 = por %p3257_p12, %p3256_p11 }
  0x5b   : > { %p3259_p7 = pnand %p3258_p6, %p3252_p4 }
  0x5d   : > { %3262 = shalt.err (!%p3259_p7)
}
  0x5e   : > { %2972 = dma.hbm_to_vmem [thread:$0]  (!%p3637_p9), %s3646_s28, 16, %s393_s21, %s3655_s8  }
  0x5f   : > { %s3461_s30 = smov [#allocation13]   ;;  %s3462_s27 = smov [#allocation16]  }
  0x60   : > { %s327_s24 = sshll.u32 %s3461_s30, 4  ;;  %s351_s5 = sshll.u32 %s3462_s27, 4  ;;  %s328_s24 = int_to_ptr.vmem [resolvable:$true] %s327_s24  ;;  %s352_s5 = int_to_ptr.vmem [resolvable:$true] %s351_s5 }
  0x61   : > { %s3274_s18 = scalar_lea.vmem %s328_s24, 16  ;;  %p4124_p3 = scmp.ne.s32.totalorder %s4114_s26, 0 }
  0x62   : > { %p3275_p1 = scmp.ne.s32.totalorder %s328_s24, %s3274_s18  ;;  %s3281_s10 = scalar_lea.vmem %s328_s24, 32 }
  0x63   : > { %p3282_p0 = scmp.lt.s32.totalorder %s328_s24, %s328_s24  ;;  %p3283_p4 = scmp.lt.s32.totalorder %s3281_s10, %s3274_s18 }
  0x64   : > { %p3277_p5 = pnand %p3275_p1, %p4124_p3 }
  0x65   : > { %p3284_p6 = por %p3283_p4, %p3282_p0 }
  0x66   : > { %p3278_p13 = pneg %p3277_p5 }
  0x68   : > { %p3285_p7 = pnand %p3284_p6, %p3278_p13 }
  0x6a   : > { %3288 = shalt.err (!%p3285_p7)
}
  0x6b   : > { %p4125_p2 = scmp.ne.s32.totalorder %s4113_s23, 0  ;;  %s3300_s21 = scalar_lea.vmem %s352_s5, 16 }
  0x6c   : > { %p3301_p8 = scmp.ne.s32.totalorder %s352_s5, %s3300_s21  ;;  %s3307_s28 = scalar_lea.vmem %s352_s5, 32 }
  0x6d   : > { %2959 = dma.hbm_to_vmem [thread:$0]  (!%p4125_p2), %s4090_s7, 16, %s328_s24, [#allocation12]  }
  0x6e   : > { %p3303_p11 = pnand %p3301_p8, %p4124_p3  ;;  %p3308_p1 = scmp.lt.s32.totalorder %s352_s5, %s352_s5 }
  0x6f   : > { %p3309_p5 = scmp.lt.s32.totalorder %s3307_s28, %s3300_s21 }
  0x70   : > { %p3304_p12 = pneg %p3303_p11 }
  0x71   : > { %p3310_p9 = por %p3309_p5, %p3308_p1 }
  0x73   : > { %p3311_p0 = pnand %p3310_p9, %p3304_p12 }
  0x75   : > { %3314 = shalt.err (!%p3311_p0)
}
  0x76   : > { %2965 = dma.hbm_to_vmem [thread:$0]  (!%p4125_p2), %s4092_s9, 16, %s352_s5, [#allocation15]  }
  0x77   : > { %s2920_s30 = smul.u32 800, %s3634_s25  ;;  %s2433_s26 = sshll.u32 %s3453_s16, 7 }
  0x78   : > { %s4126_s1 = sld [smem:[#allocation26_spill]]  ;;  %s363_s15 = scalar_lea.sflag [#allocation4], %s3634_s25 }
  0x79   : > { %s366_s10 = scalar_lea.vmem [#allocation3], %s2920_s30 }
  0x7a   : > { %s372_s23 = sshll.u32 %s366_s10, 4  ;;  %s3701_s23 = int_to_ptr.vmem [resolvable:$true] %s372_s23 }
  0x7e   : > { %s3699_s18 = scalar_lea.hbm %s4126_s1, %s2433_s26  ;;  %s3320_s28 = scalar_lea.hbm %s4126_s1, 102400 }
  0x7f   : > { %s3315_s22 = scalar_lea.hbm %s3699_s18, 12800  ;;  %p3321_p4 = scmp.lt.s32.totalorder %s3699_s18, %s4126_s1 }
  0x80   : > { %p3316_p9 = scmp.ne.s32.totalorder %s3699_s18, %s3315_s22  ;;  %p3322_p6 = scmp.lt.s32.totalorder %s3320_s28, %s3315_s22 }
  0x82   : > { %p3318_p3 = pnand %p3316_p9, %p3661_p10  ;;  %p3323_p7 = por %p3322_p6, %p3321_p4 }
  0x84   : > { %p3319_p13 = pneg %p3318_p3 }
  0x86   : > { %p3324_p2 = pnand %p3323_p7, %p3319_p13 }
  0x88   : > { %3327 = shalt.err (!%p3324_p2)
}
  0x89   : > { %s3328_s30 = scalar_lea.vmem %s3701_s23, 12800  ;;  %s3463_s26 = smov [#allocation3]  }
  0x8a   : > { %p3329_p8 = scmp.ne.s32.totalorder %s3701_s23, %s3328_s30  ;;  %s3333_s24 = sshll.u32 %s3463_s26, 4  ;;  %s3334_s24 = int_to_ptr.vmem [resolvable:$false] %s3333_s24 }
  0x8b   : > { %s3335_s27 = scalar_lea.vmem %s3334_s24, 25600  ;;  %p3336_p1 = scmp.lt.s32.totalorder %s3701_s23, %s3334_s24 }
  0x8c   : > { %p3331_p11 = pnand %p3329_p8, %p3661_p10  ;;  %p3337_p5 = scmp.lt.s32.totalorder %s3335_s27, %s3328_s30 }
  0x8e   : > { %p3332_p12 = pneg %p3331_p11  ;;  %p3338_p0 = por %p3337_p5, %p3336_p1 }
  0x90   : > { %p3339_p9 = pnand %p3338_p0, %p3332_p12 }
  0x92   : > { %3342 = shalt.err (!%p3339_p9)
}
  0x93   : > { %s3464_s10 = smov 1024   ;;  %s3465_s22 = smov 128  }
  0x94   : > { %s3466_s5 = smov 8   ;;  %p4127_p3 = scmp.ne.s32.totalorder %s4121_s12, 0 }
  0x95   : > { %s402_s21 = scalar_lea.vmem [#allocation7], %s3634_s25  ;;  %s2436_s29 = sshll.u32 %s3634_s25, 8 }
  0x96   : > { %2969 = dma.hbm_to_vmem [thread:$0]  (!%p4127_p3), %s3699_s18, 12800, %s3701_s23, %s363_s15, %s3464_s10, %s3465_s22, %s3466_s5  }
  0x97   : > { %s409_s28 = sshll.u32 %s402_s21, 4  ;;  %s3343_s6 = scalar_lea.hbm %s3651_s11, 16  ;;  %s410_s28 = int_to_ptr.vmem [resolvable:$true] %s409_s28 }
  0x98   : > { %p3344_p13 = scmp.ne.s32.totalorder %s3651_s11, %s3343_s6  ;;  %s3348_s24 = scalar_lea.hbm %s4086_s3, 128 }
  0x99   : > { %p3349_p7 = scmp.lt.s32.totalorder %s3651_s11, %s4086_s3  ;;  %p3350_p2 = scmp.lt.s32.totalorder %s3348_s24, %s3343_s6 }
  0x9a   : > { %p3346_p4 = pnand %p3344_p13, %p3661_p10 }
  0x9b   : > { %p3351_p8 = por %p3350_p2, %p3349_p7 }
  0x9c   : > { %p3347_p6 = pneg %p3346_p4 }
  0x9e   : > { %p3352_p11 = pnand %p3351_p8, %p3347_p6 }
  0xa0   : > { %3355 = shalt.err (!%p3352_p11)
}
  0xa1   : > { %s3356_s18 = scalar_lea.vmem %s410_s28, 16  ;;  %s3467_s25 = smov [#allocation7]  }
  0xa2   : > { %p3357_p12 = scmp.ne.s32.totalorder %s410_s28, %s3356_s18  ;;  %s3361_s23 = sshll.u32 %s3467_s25, 4  ;;  %s3362_s23 = int_to_ptr.vmem [resolvable:$false] %s3361_s23 }
  0xa3   : > { %s3363_s15 = scalar_lea.vmem %s3362_s23, 32  ;;  %p3364_p0 = scmp.lt.s32.totalorder %s410_s28, %s3362_s23 }
  0xa4   : > { %p3359_p1 = pnand %p3357_p12, %p3661_p10  ;;  %p3365_p9 = scmp.lt.s32.totalorder %s3363_s15, %s3356_s18 }
  0xa6   : > { %p3360_p5 = pneg %p3359_p1  ;;  %p3366_p13 = por %p3365_p9, %p3364_p0 }
  0xa8   : > { %p3367_p4 = pnand %p3366_p13, %p3360_p5 }
  0xaa   : > { %3370 = shalt.err (!%p3367_p4)
}
  0xab   : > { %2975 = dma.hbm_to_vmem [thread:$0]  (!%p4127_p3), %s3651_s11, 16, %s410_s28, %s3655_s8  }
  0xac   : > { %s2553_s1 = sshll.u32 %s3453_s16, 12  ;;  %s420_s10 = scalar_lea.vmem [#allocation8], %s2436_s29 }
  0xad   : > { %s428_s22 = sshll.u32 %s420_s10, 4  ;;  %s3749_s6 = scalar_lea.hbm %s4087_s4, %s2553_s1  ;;  %s3751_s22 = int_to_ptr.vmem [resolvable:$true] %s428_s22 }
  0xae   : > { %s4128_s30 = sand.u32 1, %s3453_s16   ;;  %s3371_s24 = scalar_lea.hbm %s3749_s6, 4096 }
  0xaf   : > { %s3755_s26 = scalar_lea.sflag [#allocation9], %s4128_s30  ;;  %p3372_p6 = scmp.ne.s32.totalorder %s3749_s6, %s3371_s24 }
  0xb0   : > { %s3376_s28 = scalar_lea.hbm %s4087_s4, 32768  ;;  %p3377_p8 = scmp.lt.s32.totalorder %s3749_s6, %s4087_s4 }
  0xb1   : > { %p3374_p7 = pnand %p3372_p6, %p3661_p10  ;;  %p3378_p11 = scmp.lt.s32.totalorder %s3376_s28, %s3371_s24 }
  0xb3   : > { %p3375_p2 = pneg %p3374_p7  ;;  %p3379_p12 = por %p3378_p11, %p3377_p8 }
  0xb5   : > { %p3380_p1 = pnand %p3379_p12, %p3375_p2 }
  0xb7   : > { %3383 = shalt.err (!%p3380_p1)
}
  0xb8   : > { %s3384_s16 = scalar_lea.vmem %s3751_s22, 4096  ;;  %s3468_s18 = smov [#allocation8]  }
  0xb9   : > { %p3385_p5 = scmp.ne.s32.totalorder %s3751_s22, %s3384_s16  ;;  %s3389_s25 = sshll.u32 %s3468_s18, 4  ;;  %s3390_s25 = int_to_ptr.vmem [resolvable:$false] %s3389_s25 }
  0xba   : > { %s3391_s23 = scalar_lea.vmem %s3390_s25, 8192  ;;  %p3392_p13 = scmp.lt.s32.totalorder %s3751_s22, %s3390_s25 }
  0xbb   : > { %p3387_p0 = pnand %p3385_p5, %p3661_p10  ;;  %p3393_p4 = scmp.lt.s32.totalorder %s3391_s23, %s3384_s16 }
  0xbd   : > { %p3388_p9 = pneg %p3387_p0  ;;  %p3394_p6 = por %p3393_p4, %p3392_p13 }
  0xbf   : > { %p3395_p7 = pnand %p3394_p6, %p3388_p9 }
  0xc1   : > { %3398 = shalt.err (!%p3395_p7)
}
  0xc2   : > { %s3469_s15 = smov 256   ;;  %s3470_s1 = smov 16  }
  0xc3   : > { %2978 = dma.hbm_to_vmem [thread:$0]  (!%p4127_p3), %s3749_s6, 4096, %s3751_s22, %s3755_s26, %s3469_s15, %s3469_s15, %s3470_s1  }
  0xc4   : > { %p4129_p10 = scmp.ne.s32.totalorder %s4112_s20, 0 }
  0xc5   : > { %s3781_s13 = sand.u32 (!%p4129_p10), 1, %s3445_s14   ;;  %p4130_p2 = scmp.ne.s32.totalorder (!%p4129_p10), %s4120_s17, 0 }
  0xc6   : > { %440 = sbr.rel (%p4129_p10) target bundleno = 1604 (0x644), region = 60  ;;  %s443_s5 = scalar_lea.sflag (!%p4129_p10), [#allocation4], %s3781_s13 }
  0xc7   : > { %s2921_s10 = smul.u32 (!%p4129_p10), 800, %s3781_s13 }
  0xc9   : > { %s3785_s21 = scalar_lea.vmem (!%p4129_p10), [#allocation3], %s2921_s10 }
  0xcb   : > { %3416 = dma.done.wait (%p4130_p2), %s443_s5, 12800  }
  0xcc   : > { %3418 = vsyncadd (%p4130_p2), %s443_s5, 4294954496  ;;  %s451_s20 = sand.u32 1, %s3553_s19   ;;  %s454_s22 = scalar_lea.vmem [#allocation5], %s3781_s13 }
  0xcd   : > { %s452_s12 = scalar_lea.sflag [#allocation6], %s451_s20 }
  0xce   : > { %3420 = dma.done.wait (%p4130_p2), %s452_s12, 32  }
  0xcf   : > { %3422 = vsyncadd (%p4130_p2), %s452_s12, 4294967264  ;;  %s2441_s6 = sshll.u32 %s3781_s13, 8  ;;  %s462_s30 = scalar_lea.vmem [#allocation7], %s3781_s13 }
  0xd0   : > { %s468_s26 = scalar_lea.sflag [#allocation9], %s451_s20  ;;  %s3799_s24 = scalar_lea.vmem [#allocation8], %s2441_s6 }
  0xd1   : > { %3424 = dma.done.wait (%p4130_p2), %s468_s26, 4096  }
  0xd2   : > { %3426 = vsyncadd (%p4130_p2), %s468_s26, 4294963200  ;;  %p4131_p3 = scmp.eq.s32.totalorder %s3553_s19, 0 }
  0xd4   : > { %3428 = dma.done.wait (%p4131_p3), [#allocation9], 64   ;;  %p4132_p8 = pmov %p4131_p3 }
  0xd5   : > { %p4133_p11 = pmov %p4131_p3 }
  0xd6   : > { %3430 = vsyncadd (%p4132_p8), [#allocation9], 4294967232 }
  0xd7   : > { %3432 = dma.done.wait (%p4133_p11), [#allocation12], 4112   ;;  %p4134_p12 = pmov %p4131_p3 }
  0xd8   : > { %p4135_p1 = pmov %p4131_p3 }
  0xd9   : > { %3434 = vsyncadd (%p4134_p12), [#allocation12], 4294963184 }
  0xda   : > { %3436 = dma.done.wait (%p4135_p1), [#allocation15], 1040   ;;  %p4136_p5 = pmov %p4135_p1 }
  0xdb   : > { %p4137_p0 = scmp.ne.s32.totalorder %s3553_s19, 0 }
  0xdc   : > { %3438 = vsyncadd (%p4136_p5), [#allocation15], 4294966256 }
  0xdd   : > { %541 = sbr.rel (%p4137_p0) target bundleno = 229 (0xe5), region = 100 }
  0xe2   : > { %v3471_v0 = vmov 0.0  }
  0xe3   : > { %542 = vst [vmem:[#allocation2 + $0x10] sm:$0xff] %v3471_v0  ;;  %543 = vst [vmem:[#allocation2] sm:$0xff] %v3471_v0 }
  0xe4   : > { %544 = vst [vmem:[#allocation2 + $0x18] sm:$0xff] %v3471_v0  ;;  %545 = vst [vmem:[#allocation2 + $0x8] sm:$0xff] %v3471_v0 }
  0xe5 PF: > { %v553_v1 = vld [vmem:[%s3785_s21 + $0x38] sm:$0xff]  ;;  %v552_v11 = vld [vmem:[%s3785_s21 + $0x30] sm:$0xff]  ;;  %v3830_v19 = vld [vmem:[%s4083_s0] sm:$0xff]  ;;  %vm3473_vm0 = vmmov 0   ;;  %p2507_p9 = scmp.ne.s32.totalorder %s3553_s19, 7 }
  0xe6   : > { %v561_v2 = vld [vmem:[%s3785_s21 + $0x78] sm:$0xff]  ;;  %v660_v4 = vunpack.c.l.s8.bf16 %v553_v1  ;;  %v661_v5 = vunpack.c.h.s8.bf16 %v553_v1  ;;  %v560_v12 = vld [vmem:[%s3785_s21 + $0x70] sm:$0xff]  ;;  %v659_v15 = vunpack.c.h.s8.bf16 %v552_v11  ;;  %v3835_v20 = vld [vmem:[%s4083_s0 + $0x8] sm:$0xff]  ;;  %v658_v23 = vunpack.c.l.s8.bf16 %v552_v11 }
  0xe7   : > { %v549_v3 = vld [vmem:[%s3785_s21 + $0x18] sm:$0xff]  ;;  %v676_v6 = vunpack.c.l.s8.bf16 %v561_v2  ;;  %v677_v7 = vunpack.c.h.s8.bf16 %v561_v2  ;;  %v675_v16 = vunpack.c.h.s8.bf16 %v560_v12  ;;  %v548_v17 = vld [vmem:[%s3785_s21 + $0x10] sm:$0xff]  ;;  %v674_v24 = vunpack.c.l.s8.bf16 %v560_v12  ;;  %v551_v26 = vld [vmem:[%s3785_s21 + $0x28] sm:$0xff] }
  0xe8   : > { %v557_v8 = vld [vmem:[%s3785_s21 + $0x58] sm:$0xff]  ;;  %v653_v9 = vunpack.c.h.s8.bf16 %v549_v3  ;;  %2554 = vmatprep.subr.bf16.mxu0 %v661_v5  ;;  %v652_v13 = vunpack.c.l.s8.bf16 %v549_v3  ;;  %v556_v18 = vld [vmem:[%s3785_s21 + $0x50] sm:$0xff]  ;;  %v651_v21 = vunpack.c.h.s8.bf16 %v548_v17  ;;  %v2449_v25 = vcombine.high %v3830_v19, %v3830_v19  ;;  %v559_v27 = vld [vmem:[%s3785_s21 + $0x68] sm:$0xff] }
  0xe9   : > { %v669_v10 = vunpack.c.h.s8.bf16 %v557_v8  ;;  %2576 = vmatprep.subr.bf16.mxu1 %v677_v7  ;;  %v668_v14 = vunpack.c.l.s8.bf16 %v557_v8  ;;  %v667_v22 = vunpack.c.h.s8.bf16 %v556_v18  ;;  %v2451_v28 = vcombine.high %v3835_v20, %v3835_v20  ;;  %v547_v33 = vld [vmem:[%s3785_s21 + $0x8] sm:$0xff]  ;;  %v550_v39 = vld [vmem:[%s3785_s21 + $0x20] sm:$0xff]  ;;  %v569_v51 = vld [vmem:[%s3785_s21 + $0xb8] sm:$0xff] }
  0xea   : > { %2555 = vmatpush3.bf16.msra.mxu0 %v653_v9  ;;  %979 = vmatprep.mubr.bf16.mxu0 %v2449_v25  ;;  %v650_v29 = vunpack.c.l.s8.bf16 %v548_v17  ;;  %v666_v30 = vunpack.c.l.s8.bf16 %v556_v18  ;;  %v657_v31 = vunpack.c.h.s8.bf16 %v551_v26  ;;  %v673_v32 = vunpack.c.h.s8.bf16 %v559_v27  ;;  %v555_v34 = vld [vmem:[%s3785_s21 + $0x48] sm:$0xff]  ;;  %v558_v40 = vld [vmem:[%s3785_s21 + $0x60] sm:$0xff]  ;;  %v577_v52 = vld [vmem:[%s3785_s21 + $0xf8] sm:$0xff] }
  0xeb   : > { %2577 = vmatpush3.bf16.msra.mxu1 %v669_v10  ;;  %2556 = vmatprep.subr.bf16.mxu0 %v660_v4  ;;  %v649_v35 = vunpack.c.h.s8.bf16 %v547_v33  ;;  %v665_v36 = vunpack.c.h.s8.bf16 %v555_v34  ;;  %v656_v37 = vunpack.c.l.s8.bf16 %v551_v26  ;;  %v672_v38 = vunpack.c.l.s8.bf16 %v559_v27  ;;  %v546_v45 = vld [vmem:[%s3785_s21] sm:$0xff]  ;;  %v565_v55 = vld [vmem:[%s3785_s21 + $0x98] sm:$0xff]  ;;  %v3856_v59 = vld [vmem:[%s4083_s0 + $0x10] sm:$0xff] }
  0xec   : > { %2578 = vmatprep.subr.bf16.mxu1 %v676_v6  ;;  %1019 = vmatprep.mubr.bf16.mxu1 %v2451_v28  ;;  %v648_v41 = vunpack.c.l.s8.bf16 %v547_v33  ;;  %v664_v42 = vunpack.c.l.s8.bf16 %v555_v34  ;;  %v655_v43 = vunpack.c.h.s8.bf16 %v550_v39  ;;  %v671_v44 = vunpack.c.h.s8.bf16 %v558_v40  ;;  %v554_v46 = vld [vmem:[%s3785_s21 + $0x40] sm:$0xff]  ;;  %v573_v56 = vld [vmem:[%s3785_s21 + $0xd8] sm:$0xff]  ;;  %v568_v3 = vld [vmem:[%s3785_s21 + $0xb0] sm:$0xff] }
  0xed   : > { %v647_v47 = vunpack.c.h.s8.bf16 %v546_v45  ;;  %v663_v48 = vunpack.c.h.s8.bf16 %v554_v46  ;;  %v654_v49 = vunpack.c.l.s8.bf16 %v550_v39  ;;  %v670_v50 = vunpack.c.l.s8.bf16 %v558_v40  ;;  %v3865_v62 = vld [vmem:[%s4083_s0 + $0x18] sm:$0xff]  ;;  %v576_v4 = vld [vmem:[%s3785_s21 + $0xf0] sm:$0xff]  ;;  %v567_v17 = vld [vmem:[%s3785_s21 + $0xa8] sm:$0xff] }
  0xee   : > { %2557 = vmatpush3.bf16.msra.mxu0 %v652_v13  ;;  %v646_v53 = vunpack.c.l.s8.bf16 %v546_v45  ;;  %v662_v54 = vunpack.c.l.s8.bf16 %v554_v46  ;;  %v693_v57 = vunpack.c.h.s8.bf16 %v569_v51  ;;  %v709_v58 = vunpack.c.h.s8.bf16 %v577_v52  ;;  %v564_v7 = vld [vmem:[%s3785_s21 + $0x90] sm:$0xff]  ;;  %v575_v18 = vld [vmem:[%s3785_s21 + $0xe8] sm:$0xff]  ;;  %v562_v34 = vld [vmem:[%s3785_s21 + $0x80] sm:$0xff] }
  0xef   : > { %2579 = vmatpush3.bf16.msra.mxu1 %v668_v14  ;;  %2558 = vmatprep.subr.bf16.mxu0 %v659_v15  ;;  %v2448_v60 = vcombine.low %v3830_v19, %v3830_v19  ;;  %v2450_v61 = vcombine.low %v3835_v20, %v3835_v20  ;;  %v685_v63 = vunpack.c.h.s8.bf16 %v565_v55  ;;  %v701_v0 = vunpack.c.h.s8.bf16 %v573_v56  ;;  %v572_v8 = vld [vmem:[%s3785_s21 + $0xd0] sm:$0xff]  ;;  %v581_v46 = vld [vmem:[%s3785_s21 + $0x118] sm:$0xff] }
  0xf0   : > { %2580 = vmatprep.subr.bf16.mxu1 %v675_v16  ;;  %v692_v1 = vunpack.c.l.s8.bf16 %v569_v51  ;;  %v708_v2 = vunpack.c.l.s8.bf16 %v577_v52  ;;  %v2453_v5 = vcombine.high %v3856_v59, %v3856_v59  ;;  %v2455_v6 = vcombine.high %v3865_v62, %v3865_v62  ;;  %v3894_v51 = vld [vmem:[%s4083_s0 + $0x20] sm:$0xff]  ;;  %v3899_v52 = vld [vmem:[%s4083_s0 + $0x28] sm:$0xff] }
  0xf1   : > { %v684_v9 = vunpack.c.l.s8.bf16 %v565_v55  ;;  %v700_v10 = vunpack.c.l.s8.bf16 %v573_v56  ;;  %v691_v11 = vunpack.c.h.s8.bf16 %v568_v3  ;;  %v707_v12 = vunpack.c.h.s8.bf16 %v576_v4 }
  0xf2   : > { %2559 = vmatpush3.bf16.msra.mxu0 %v651_v21  ;;  %v683_v13 = vunpack.c.h.s8.bf16 %v564_v7  ;;  %v699_v14 = vunpack.c.h.s8.bf16 %v572_v8  ;;  %v690_v15 = vunpack.c.l.s8.bf16 %v568_v3  ;;  %v706_v16 = vunpack.c.l.s8.bf16 %v576_v4 }
  0xf3   : > { %2581 = vmatpush3.bf16.msra.mxu1 %v667_v22  ;;  %2560 = vmatprep.subr.bf16.mxu0 %v658_v23  ;;  %v682_v19 = vunpack.c.l.s8.bf16 %v564_v7  ;;  %v698_v20 = vunpack.c.l.s8.bf16 %v572_v8  ;;  %v689_v21 = vunpack.c.h.s8.bf16 %v567_v17  ;;  %v563_v22 = vld [vmem:[%s3785_s21 + $0x88] sm:$0xff]  ;;  %v705_v23 = vunpack.c.h.s8.bf16 %v575_v18 }
  0xf4   : > { %2582 = vmatprep.subr.bf16.mxu1 %v674_v24  ;;  %v571_v24 = vld [vmem:[%s3785_s21 + $0xc8] sm:$0xff]  ;;  %v681_v25 = vunpack.c.h.s8.bf16 %v563_v22  ;;  %v688_v27 = vunpack.c.l.s8.bf16 %v567_v17  ;;  %v704_v28 = vunpack.c.l.s8.bf16 %v575_v18 }
  0xf5   : > { %v697_v26 = vunpack.c.h.s8.bf16 %v571_v24  ;;  %v583_v7 = vld [vmem:[%s3785_s21 + $0x128] sm:$0xff] }
  0xf6   : > { %2561 = vmatpush3.bf16.msra.mxu0 %v650_v29  ;;  %v566_v29 = vld [vmem:[%s3785_s21 + $0xa0] sm:$0xff]  ;;  %v591_v8 = vld [vmem:[%s3785_s21 + $0x168] sm:$0xff]  ;;  %v720_v17 = vunpack.c.l.s8.bf16 %v583_v7 }
  0xf7   : > { %2583 = vmatpush3.bf16.msra.mxu1 %v666_v30  ;;  %2562 = vmatprep.subr.bf16.mxu0 %v657_v31  ;;  %v574_v30 = vld [vmem:[%s3785_s21 + $0xe0] sm:$0xff]  ;;  %v680_v31 = vunpack.c.l.s8.bf16 %v563_v22  ;;  %v687_v33 = vunpack.c.h.s8.bf16 %v566_v29  ;;  %v686_v39 = vunpack.c.l.s8.bf16 %v566_v29  ;;  %v736_v18 = vunpack.c.l.s8.bf16 %v591_v8 }
  0xf8   : > { %2584 = vmatprep.subr.bf16.mxu1 %v673_v32  ;;  %v696_v32 = vunpack.c.l.s8.bf16 %v571_v24  ;;  %v702_v40 = vunpack.c.l.s8.bf16 %v574_v30  ;;  %v578_v24 = vld [vmem:[%s3785_s21 + $0x100] sm:$0xff] }
  0xfa   : > { %2563 = vmatpush3.bf16.msra.mxu0 %v649_v35  ;;  %v703_v35 = vunpack.c.h.s8.bf16 %v574_v30 }
  0xfb   : > { %2585 = vmatpush3.bf16.msra.mxu1 %v665_v36  ;;  %2564 = vmatprep.subr.bf16.mxu0 %v656_v37  ;;  %v570_v36 = vld [vmem:[%s3785_s21 + $0xc0] sm:$0xff]  ;;  %v679_v37 = vunpack.c.h.s8.bf16 %v562_v34 }
  0xfc   : > { %2586 = vmatprep.subr.bf16.mxu1 %v672_v38  ;;  %v695_v38 = vunpack.c.h.s8.bf16 %v570_v36 }
  0xfe   : > { %2565 = vmatpush3.bf16.msra.mxu0 %v648_v41  ;;  %v585_v41 = vld [vmem:[%s3785_s21 + $0x138] sm:$0xff] }
  0xff   : > { %2587 = vmatpush3.bf16.msra.mxu1 %v664_v42  ;;  %2566 = vmatprep.subr.bf16.mxu0 %v655_v43  ;;  %v593_v42 = vld [vmem:[%s3785_s21 + $0x178] sm:$0xff]  ;;  %v678_v43 = vunpack.c.l.s8.bf16 %v562_v34  ;;  %v725_v45 = vunpack.c.h.s8.bf16 %v585_v41  ;;  %v724_v55 = vunpack.c.l.s8.bf16 %v585_v41  ;;  %v3928_v41 = vld [vmem:[%s4083_s0 + $0x30] sm:$0xff] }
 0x100   : > { %2588 = vmatprep.subr.bf16.mxu1 %v671_v44  ;;  %v694_v44 = vunpack.c.l.s8.bf16 %v570_v36  ;;  %v740_v56 = vunpack.c.l.s8.bf16 %v593_v42  ;;  %v597_v36 = vld [vmem:[%s3785_s21 + $0x198] sm:$0xff] }
 0x102   : > { %2567 = vmatpush3.bf16.msra.mxu0 %v647_v47  ;;  %v741_v47 = vunpack.c.h.s8.bf16 %v593_v42  ;;  %v3933_v42 = vld [vmem:[%s4083_s0 + $0x38] sm:$0xff] }
 0x103   : > { %2589 = vmatpush3.bf16.msra.mxu1 %v663_v48  ;;  %2568 = vmatprep.subr.bf16.mxu0 %v654_v49  ;;  %v589_v48 = vld [vmem:[%s3785_s21 + $0x158] sm:$0xff]  ;;  %v2452_v49 = vcombine.low %v3856_v59, %v3856_v59  ;;  %v2457_v59 = vcombine.high %v3894_v51, %v3894_v51 }
 0x104   : > { %2590 = vmatprep.subr.bf16.mxu1 %v670_v50  ;;  %v2454_v50 = vcombine.low %v3865_v62, %v3865_v62  ;;  %v732_v62 = vunpack.c.l.s8.bf16 %v589_v48 }
 0x106   : > { %2569 = vmatpush3.bf16.msra.mxu0 %v646_v53  ;;  %v717_v53 = vunpack.c.h.s8.bf16 %v581_v46 }
 0x107   : > { %2591 = vmatpush3.bf16.msra.mxu1 %v662_v54  ;;  %2598 = vmatprep.subr.bf16.mxu0 %v693_v57  ;;  %v733_v54 = vunpack.c.h.s8.bf16 %v589_v48  ;;  %v584_v57 = vld [vmem:[%s3785_s21 + $0x130] sm:$0xff] }
 0x108   : > { %2620 = vmatprep.subr.bf16.mxu1 %v709_v58  ;;  %v592_v58 = vld [vmem:[%s3785_s21 + $0x170] sm:$0xff] }
 0x109   : > { %980 = vmatmul.mubr.bf16.vlgmr.msra.gmra.mxu0 %v2448_v60  ;;  %v2459_v60 = vcombine.high %v3899_v52, %v3899_v52  ;;  %v608_v48 = vld [vmem:[%s3785_s21 + $0x1f0] sm:$0xff] }
 0x10a   : > { %1020 = vmatmul.mubr.bf16.vlgmr.msra.gmra.mxu1 %v2450_v61  ;;  %2599 = vmatpush3.bf16.msra.mxu0 %v685_v63  ;;  %v716_v61 = vunpack.c.l.s8.bf16 %v581_v46  ;;  %v723_v63 = vunpack.c.h.s8.bf16 %v584_v57 }
 0x10b   : > { %2621 = vmatpush3.bf16.msra.mxu1 %v701_v0  ;;  %2600 = vmatprep.subr.bf16.mxu0 %v692_v1  ;;  %v580_v0 = vld [vmem:[%s3785_s21 + $0x110] sm:$0xff]  ;;  %v739_v1 = vunpack.c.h.s8.bf16 %v592_v58 }
 0x10c   : > { %2622 = vmatprep.subr.bf16.mxu1 %v708_v2  ;;  %1059 = vmatprep.mubr.bf16.mxu0 %v2453_v5  ;;  %v588_v2 = vld [vmem:[%s3785_s21 + $0x150] sm:$0xff]  ;;  %v715_v3 = vunpack.c.h.s8.bf16 %v580_v0  ;;  %v722_v5 = vunpack.c.l.s8.bf16 %v584_v57 }
 0x10d   : > { %1099 = vmatprep.mubr.bf16.mxu1 %v2455_v6  ;;  %v731_v4 = vunpack.c.h.s8.bf16 %v588_v2  ;;  %v738_v6 = vunpack.c.l.s8.bf16 %v592_v58 }
 0x10e   : > { %2601 = vmatpush3.bf16.msra.mxu0 %v684_v9  ;;  %v714_v9 = vunpack.c.l.s8.bf16 %v580_v0 }
 0x10f   : > { %2623 = vmatpush3.bf16.msra.mxu1 %v700_v10  ;;  %2602 = vmatprep.subr.bf16.mxu0 %v691_v11  ;;  %v730_v10 = vunpack.c.l.s8.bf16 %v588_v2  ;;  %v721_v11 = vunpack.c.h.s8.bf16 %v583_v7  ;;  %v595_v2 = vld [vmem:[%s3785_s21 + $0x188] sm:$0xff] }
 0x110   : > { %2624 = vmatprep.subr.bf16.mxu1 %v707_v12  ;;  %v579_v12 = vld [vmem:[%s3785_s21 + $0x108] sm:$0xff] }
 0x112   : > { %2603 = vmatpush3.bf16.msra.mxu0 %v683_v13  ;;  %v737_v13 = vunpack.c.h.s8.bf16 %v591_v8 }
 0x113   : > { %2625 = vmatpush3.bf16.msra.mxu1 %v699_v14  ;;  %2604 = vmatprep.subr.bf16.mxu0 %v690_v15  ;;  %v587_v14 = vld [vmem:[%s3785_s21 + $0x148] sm:$0xff]  ;;  %v713_v15 = vunpack.c.h.s8.bf16 %v579_v12 }
 0x114   : > { %2626 = vmatprep.subr.bf16.mxu1 %v706_v16  ;;  %v729_v16 = vunpack.c.h.s8.bf16 %v587_v14  ;;  %v728_v22 = vunpack.c.l.s8.bf16 %v587_v14  ;;  %v594_v14 = vld [vmem:[%s3785_s21 + $0x180] sm:$0xff] }
 0x116   : > { %2605 = vmatpush3.bf16.msra.mxu0 %v682_v19  ;;  %v582_v19 = vld [vmem:[%s3785_s21 + $0x120] sm:$0xff] }
 0x117   : > { %2627 = vmatpush3.bf16.msra.mxu1 %v698_v20  ;;  %2606 = vmatprep.subr.bf16.mxu0 %v689_v21  ;;  %v590_v20 = vld [vmem:[%s3785_s21 + $0x160] sm:$0xff]  ;;  %v712_v21 = vunpack.c.l.s8.bf16 %v579_v12  ;;  %v718_v29 = vunpack.c.l.s8.bf16 %v582_v19 }
 0x118   : > { %2628 = vmatprep.subr.bf16.mxu1 %v705_v23  ;;  %v719_v23 = vunpack.c.h.s8.bf16 %v582_v19  ;;  %v734_v30 = vunpack.c.l.s8.bf16 %v590_v20 }
 0x11a   : > { %2607 = vmatpush3.bf16.msra.mxu0 %v681_v25  ;;  %v735_v25 = vunpack.c.h.s8.bf16 %v590_v20 }
 0x11b   : > { %2629 = vmatpush3.bf16.msra.mxu1 %v697_v26  ;;  %2608 = vmatprep.subr.bf16.mxu0 %v688_v27  ;;  %v586_v26 = vld [vmem:[%s3785_s21 + $0x140] sm:$0xff]  ;;  %v711_v27 = vunpack.c.h.s8.bf16 %v578_v24 }
 0x11c   : > { %2630 = vmatprep.subr.bf16.mxu1 %v704_v28  ;;  %v727_v28 = vunpack.c.h.s8.bf16 %v586_v26  ;;  %v726_v34 = vunpack.c.l.s8.bf16 %v586_v26  ;;  %v613_v26 = vld [vmem:[%s3785_s21 + $0x218] sm:$0xff] }
 0x11e   : > { %2609 = vmatpush3.bf16.msra.mxu0 %v680_v31  ;;  %v601_v31 = vld [vmem:[%s3785_s21 + $0x1b8] sm:$0xff] }
 0x11f   : > { %2631 = vmatpush3.bf16.msra.mxu1 %v696_v32  ;;  %2610 = vmatprep.subr.bf16.mxu0 %v687_v33  ;;  %v609_v32 = vld [vmem:[%s3785_s21 + $0x1f8] sm:$0xff]  ;;  %v710_v33 = vunpack.c.l.s8.bf16 %v578_v24 }
 0x120   : > { %2632 = vmatprep.subr.bf16.mxu1 %v703_v35  ;;  %v757_v35 = vunpack.c.h.s8.bf16 %v601_v31  ;;  %v772_v46 = vunpack.c.l.s8.bf16 %v609_v32 }
 0x122   : > { %2611 = vmatpush3.bf16.msra.mxu0 %v679_v37  ;;  %v773_v37 = vunpack.c.h.s8.bf16 %v609_v32  ;;  %v3967_v32 = vld [vmem:[%s4083_s0 + $0x48] sm:$0xff] }
 0x123   : > { %2633 = vmatpush3.bf16.msra.mxu1 %v695_v38  ;;  %2612 = vmatprep.subr.bf16.mxu0 %v686_v39  ;;  %v605_v38 = vld [vmem:[%s3785_s21 + $0x1d8] sm:$0xff]  ;;  %v2456_v39 = vcombine.low %v3894_v51, %v3894_v51  ;;  %v748_v51 = vunpack.c.l.s8.bf16 %v597_v36 }
 0x124   : > { %2634 = vmatprep.subr.bf16.mxu1 %v702_v40  ;;  %v2458_v40 = vcombine.low %v3899_v52, %v3899_v52  ;;  %v764_v52 = vunpack.c.l.s8.bf16 %v605_v38 }
 0x126   : > { %2613 = vmatpush3.bf16.msra.mxu0 %v678_v43  ;;  %v749_v43 = vunpack.c.h.s8.bf16 %v597_v36 }
 0x127   : > { %2635 = vmatpush3.bf16.msra.mxu1 %v694_v44  ;;  %2642 = vmatprep.subr.bf16.mxu0 %v725_v45  ;;  %v765_v44 = vunpack.c.h.s8.bf16 %v605_v38  ;;  %v756_v45 = vunpack.c.l.s8.bf16 %v601_v31  ;;  %v3962_v31 = vld [vmem:[%s4083_s0 + $0x40] sm:$0xff]  ;;  %v624_v38 = vld [vmem:[%s3785_s21 + $0x270] sm:$0xff] }
 0x128   : > { %2664 = vmatprep.subr.bf16.mxu1 %v741_v47  ;;  %v600_v47 = vld [vmem:[%s3785_s21 + $0x1b0] sm:$0xff] }
 0x129   : > { %1060 = vmatmul.mubr.bf16.vlgmr.msra.gmra.mxu0 %v2452_v49  ;;  %v2461_v49 = vcombine.high %v3928_v41, %v3928_v41 }
 0x12a   : > { %1100 = vmatmul.mubr.bf16.vlgmr.msra.gmra.mxu1 %v2454_v50  ;;  %2643 = vmatpush3.bf16.msra.mxu0 %v717_v53  ;;  %v2463_v50 = vcombine.high %v3933_v42, %v3933_v42  ;;  %v755_v53 = vunpack.c.h.s8.bf16 %v600_v47 }
 0x12b   : > { %2665 = vmatpush3.bf16.msra.mxu1 %v733_v54  ;;  %2644 = vmatprep.subr.bf16.mxu0 %v724_v55  ;;  %v596_v54 = vld [vmem:[%s3785_s21 + $0x190] sm:$0xff]  ;;  %v771_v55 = vunpack.c.h.s8.bf16 %v608_v48 }
 0x12c   : > { %2666 = vmatprep.subr.bf16.mxu1 %v740_v56  ;;  %1139 = vmatprep.mubr.bf16.mxu0 %v2457_v59  ;;  %v604_v56 = vld [vmem:[%s3785_s21 + $0x1d0] sm:$0xff]  ;;  %v747_v57 = vunpack.c.h.s8.bf16 %v596_v54  ;;  %v754_v59 = vunpack.c.l.s8.bf16 %v600_v47 }
 0x12d   : > { %1179 = vmatprep.mubr.bf16.mxu1 %v2459_v60  ;;  %v763_v58 = vunpack.c.h.s8.bf16 %v604_v56  ;;  %v770_v60 = vunpack.c.l.s8.bf16 %v608_v48  ;;  %v762_v0 = vunpack.c.l.s8.bf16 %v604_v56  ;;  %v611_v56 = vld [vmem:[%s3785_s21 + $0x208] sm:$0xff] }
 0x12e   : > { %2645 = vmatpush3.bf16.msra.mxu0 %v716_v61  ;;  %v599_v61 = vld [vmem:[%s3785_s21 + $0x1a8] sm:$0xff] }
 0x12f   : > { %2667 = vmatpush3.bf16.msra.mxu1 %v732_v62  ;;  %2646 = vmatprep.subr.bf16.mxu0 %v723_v63  ;;  %v607_v62 = vld [vmem:[%s3785_s21 + $0x1e8] sm:$0xff]  ;;  %v746_v63 = vunpack.c.l.s8.bf16 %v596_v54  ;;  %v752_v7 = vunpack.c.l.s8.bf16 %v599_v61 }
 0x130   : > { %2668 = vmatprep.subr.bf16.mxu1 %v739_v1  ;;  %v753_v1 = vunpack.c.h.s8.bf16 %v599_v61  ;;  %v768_v8 = vunpack.c.l.s8.bf16 %v607_v62 }
 0x132   : > { %2647 = vmatpush3.bf16.msra.mxu0 %v715_v3  ;;  %v769_v3 = vunpack.c.h.s8.bf16 %v607_v62 }
 0x133   : > { %2669 = vmatpush3.bf16.msra.mxu1 %v731_v4  ;;  %2648 = vmatprep.subr.bf16.mxu0 %v722_v5  ;;  %v603_v4 = vld [vmem:[%s3785_s21 + $0x1c8] sm:$0xff]  ;;  %v745_v5 = vunpack.c.h.s8.bf16 %v595_v2 }
 0x134   : > { %2670 = vmatprep.subr.bf16.mxu1 %v738_v6  ;;  %v761_v6 = vunpack.c.h.s8.bf16 %v603_v4  ;;  %v760_v12 = vunpack.c.l.s8.bf16 %v603_v4  ;;  %v610_v4 = vld [vmem:[%s3785_s21 + $0x200] sm:$0xff] }
 0x136   : > { %2649 = vmatpush3.bf16.msra.mxu0 %v714_v9  ;;  %v598_v9 = vld [vmem:[%s3785_s21 + $0x1a0] sm:$0xff] }
 0x137   : > { %2671 = vmatpush3.bf16.msra.mxu1 %v730_v10  ;;  %2650 = vmatprep.subr.bf16.mxu0 %v721_v11  ;;  %v606_v10 = vld [vmem:[%s3785_s21 + $0x1e0] sm:$0xff]  ;;  %v744_v11 = vunpack.c.l.s8.bf16 %v595_v2  ;;  %v750_v19 = vunpack.c.l.s8.bf16 %v598_v9 }
 0x138   : > { %2672 = vmatprep.subr.bf16.mxu1 %v737_v13  ;;  %v751_v13 = vunpack.c.h.s8.bf16 %v598_v9  ;;  %v766_v20 = vunpack.c.l.s8.bf16 %v606_v10 }
 0x13a   : > { %2651 = vmatpush3.bf16.msra.mxu0 %v713_v15  ;;  %v767_v15 = vunpack.c.h.s8.bf16 %v606_v10 }
 0x13b   : > { %2673 = vmatpush3.bf16.msra.mxu1 %v729_v16  ;;  %2652 = vmatprep.subr.bf16.mxu0 %v720_v17  ;;  %v602_v16 = vld [vmem:[%s3785_s21 + $0x1c0] sm:$0xff]  ;;  %v743_v17 = vunpack.c.h.s8.bf16 %v594_v14 }
 0x13c   : > { %2674 = vmatprep.subr.bf16.mxu1 %v736_v18  ;;  %v759_v18 = vunpack.c.h.s8.bf16 %v602_v16  ;;  %v758_v24 = vunpack.c.l.s8.bf16 %v602_v16  ;;  %v629_v16 = vld [vmem:[%s3785_s21 + $0x298] sm:$0xff] }
 0x13e   : > { %2653 = vmatpush3.bf16.msra.mxu0 %v712_v21  ;;  %v617_v21 = vld [vmem:[%s3785_s21 + $0x238] sm:$0xff] }
 0x13f   : > { %2675 = vmatpush3.bf16.msra.mxu1 %v728_v22  ;;  %2654 = vmatprep.subr.bf16.mxu0 %v719_v23  ;;  %v625_v22 = vld [vmem:[%s3785_s21 + $0x278] sm:$0xff]  ;;  %v742_v23 = vunpack.c.l.s8.bf16 %v594_v14 }
 0x140   : > { %2676 = vmatprep.subr.bf16.mxu1 %v735_v25  ;;  %v789_v25 = vunpack.c.h.s8.bf16 %v617_v21  ;;  %v804_v36 = vunpack.c.l.s8.bf16 %v625_v22 }
 0x142   : > { %2655 = vmatpush3.bf16.msra.mxu0 %v711_v27  ;;  %v805_v27 = vunpack.c.h.s8.bf16 %v625_v22  ;;  %v4001_v22 = vld [vmem:[%s4083_s0 + $0x58] sm:$0xff] }
 0x143   : > { %2677 = vmatpush3.bf16.msra.mxu1 %v727_v28  ;;  %2656 = vmatprep.subr.bf16.mxu0 %v718_v29  ;;  %v621_v28 = vld [vmem:[%s3785_s21 + $0x258] sm:$0xff]  ;;  %v2460_v29 = vcombine.low %v3928_v41, %v3928_v41  ;;  %v780_v41 = vunpack.c.l.s8.bf16 %v613_v26 }
 0x144   : > { %2678 = vmatprep.subr.bf16.mxu1 %v734_v30  ;;  %v2462_v30 = vcombine.low %v3933_v42, %v3933_v42  ;;  %v796_v42 = vunpack.c.l.s8.bf16 %v621_v28 }
 0x146   : > { %2657 = vmatpush3.bf16.msra.mxu0 %v710_v33  ;;  %v781_v33 = vunpack.c.h.s8.bf16 %v613_v26 }
 0x147   : > { %2679 = vmatpush3.bf16.msra.mxu1 %v726_v34  ;;  %2686 = vmatprep.subr.bf16.mxu0 %v757_v35  ;;  %v797_v34 = vunpack.c.h.s8.bf16 %v621_v28  ;;  %v788_v35 = vunpack.c.l.s8.bf16 %v617_v21  ;;  %v3996_v21 = vld [vmem:[%s4083_s0 + $0x50] sm:$0xff] }
 0x148   : > { %2708 = vmatprep.subr.bf16.mxu1 %v773_v37  ;;  %v616_v37 = vld [vmem:[%s3785_s21 + $0x230] sm:$0xff] }
 0x149   : > { %1140 = vmatmul.mubr.bf16.vlgmr.msra.gmra.mxu0 %v2456_v39  ;;  %v2465_v39 = vcombine.high %v3962_v31, %v3962_v31  ;;  %v640_v28 = vld [vmem:[%s3785_s21 + $0x2f0] sm:$0xff] }
 0x14a   : > { %1180 = vmatmul.mubr.bf16.vlgmr.msra.gmra.mxu1 %v2458_v40  ;;  %2687 = vmatpush3.bf16.msra.mxu0 %v749_v43  ;;  %v2467_v40 = vcombine.high %v3967_v32, %v3967_v32  ;;  %v787_v43 = vunpack.c.h.s8.bf16 %v616_v37 }
 0x14b   : > { %2709 = vmatpush3.bf16.msra.mxu1 %v765_v44  ;;  %2688 = vmatprep.subr.bf16.mxu0 %v756_v45  ;;  %v612_v44 = vld [vmem:[%s3785_s21 + $0x210] sm:$0xff]  ;;  %v803_v45 = vunpack.c.h.s8.bf16 %v624_v38 }
 0x14c   : > { %2710 = vmatprep.subr.bf16.mxu1 %v772_v46  ;;  %1219 = vmatprep.mubr.bf16.mxu0 %v2461_v49  ;;  %v620_v46 = vld [vmem:[%s3785_s21 + $0x250] sm:$0xff]  ;;  %v779_v47 = vunpack.c.h.s8.bf16 %v612_v44  ;;  %v786_v49 = vunpack.c.l.s8.bf16 %v616_v37 }
 0x14d   : > { %1259 = vmatprep.mubr.bf16.mxu1 %v2463_v50  ;;  %v795_v48 = vunpack.c.h.s8.bf16 %v620_v46  ;;  %v802_v50 = vunpack.c.l.s8.bf16 %v624_v38  ;;  %v794_v54 = vunpack.c.l.s8.bf16 %v620_v46  ;;  %v627_v46 = vld [vmem:[%s3785_s21 + $0x288] sm:$0xff] }
 0x14e   : > { %2689 = vmatpush3.bf16.msra.mxu0 %v748_v51  ;;  %v615_v51 = vld [vmem:[%s3785_s21 + $0x228] sm:$0xff] }
 0x14f   : > { %2711 = vmatpush3.bf16.msra.mxu1 %v764_v52  ;;  %2690 = vmatprep.subr.bf16.mxu0 %v755_v53  ;;  %v623_v52 = vld [vmem:[%s3785_s21 + $0x268] sm:$0xff]  ;;  %v778_v53 = vunpack.c.l.s8.bf16 %v612_v44  ;;  %v784_v61 = vunpack.c.l.s8.bf16 %v615_v51 }
 0x150   : > { %2712 = vmatprep.subr.bf16.mxu1 %v771_v55  ;;  %v785_v55 = vunpack.c.h.s8.bf16 %v615_v51  ;;  %v800_v62 = vunpack.c.l.s8.bf16 %v623_v52 }
 0x152   : > { %2691 = vmatpush3.bf16.msra.mxu0 %v747_v57  ;;  %v801_v57 = vunpack.c.h.s8.bf16 %v623_v52 }
 0x153   : > { %2713 = vmatpush3.bf16.msra.mxu1 %v763_v58  ;;  %2692 = vmatprep.subr.bf16.mxu0 %v754_v59  ;;  %v619_v58 = vld [vmem:[%s3785_s21 + $0x248] sm:$0xff]  ;;  %v777_v59 = vunpack.c.h.s8.bf16 %v611_v56 }
 0x154   : > { %2714 = vmatprep.subr.bf16.mxu1 %v770_v60  ;;  %v793_v60 = vunpack.c.h.s8.bf16 %v619_v58  ;;  %v792_v2 = vunpack.c.l.s8.bf16 %v619_v58  ;;  %v626_v58 = vld [vmem:[%s3785_s21 + $0x280] sm:$0xff] }
 0x156   : > { %2693 = vmatpush3.bf16.msra.mxu0 %v746_v63  ;;  %v614_v63 = vld [vmem:[%s3785_s21 + $0x220] sm:$0xff] }
 0x157   : > { %2715 = vmatpush3.bf16.msra.mxu1 %v762_v0  ;;  %2694 = vmatprep.subr.bf16.mxu0 %v753_v1  ;;  %v622_v0 = vld [vmem:[%s3785_s21 + $0x260] sm:$0xff]  ;;  %v776_v1 = vunpack.c.l.s8.bf16 %v611_v56  ;;  %v782_v9 = vunpack.c.l.s8.bf16 %v614_v63 }
 0x158   : > { %2716 = vmatprep.subr.bf16.mxu1 %v769_v3  ;;  %v783_v3 = vunpack.c.h.s8.bf16 %v614_v63  ;;  %v798_v10 = vunpack.c.l.s8.bf16 %v622_v0 }
 0x15a   : > { %2695 = vmatpush3.bf16.msra.mxu0 %v745_v5  ;;  %v799_v5 = vunpack.c.h.s8.bf16 %v622_v0 }
 0x15b   : > { %2717 = vmatpush3.bf16.msra.mxu1 %v761_v6  ;;  %2696 = vmatprep.subr.bf16.mxu0 %v752_v7  ;;  %v618_v6 = vld [vmem:[%s3785_s21 + $0x240] sm:$0xff]  ;;  %v775_v7 = vunpack.c.h.s8.bf16 %v610_v4 }
 0x15c   : > { %2718 = vmatprep.subr.bf16.mxu1 %v768_v8  ;;  %v791_v8 = vunpack.c.h.s8.bf16 %v618_v6  ;;  %v790_v14 = vunpack.c.l.s8.bf16 %v618_v6 }
 0x15e   : > { %2697 = vmatpush3.bf16.msra.mxu0 %v744_v11  ;;  %v633_v11 = vld [vmem:[%s3785_s21 + $0x2b8] sm:$0xff] }
 0x15f   : > { %2719 = vmatpush3.bf16.msra.mxu1 %v760_v12  ;;  %2698 = vmatprep.subr.bf16.mxu0 %v751_v13  ;;  %v641_v12 = vld [vmem:[%s3785_s21 + $0x2f8] sm:$0xff]  ;;  %v774_v13 = vunpack.c.l.s8.bf16 %v610_v4  ;;  %v2468_v4 = vcombine.low %v3996_v21, %v3996_v21 }
 0x160   : > { %2720 = vmatprep.subr.bf16.mxu1 %v767_v15  ;;  %v821_v15 = vunpack.c.h.s8.bf16 %v633_v11  ;;  %v836_v26 = vunpack.c.l.s8.bf16 %v641_v12 }
 0x162   : > { %2699 = vmatpush3.bf16.msra.mxu0 %v743_v17  ;;  %v837_v17 = vunpack.c.h.s8.bf16 %v641_v12  ;;  %v643_v12 = vld [vmem:[%s3785_s21 + $0x308] sm:$0xff] }
 0x163   : > { %2721 = vmatpush3.bf16.msra.mxu1 %v759_v18  ;;  %2700 = vmatprep.subr.bf16.mxu0 %v750_v19  ;;  %v637_v18 = vld [vmem:[%s3785_s21 + $0x2d8] sm:$0xff]  ;;  %v2464_v19 = vcombine.low %v3962_v31, %v3962_v31  ;;  %v812_v31 = vunpack.c.l.s8.bf16 %v629_v16 }
 0x164   : > { %2722 = vmatprep.subr.bf16.mxu1 %v766_v20  ;;  %v2466_v20 = vcombine.low %v3967_v32, %v3967_v32  ;;  %v828_v32 = vunpack.c.l.s8.bf16 %v637_v18 }
 0x166   : > { %2701 = vmatpush3.bf16.msra.mxu0 %v742_v23  ;;  %v813_v23 = vunpack.c.h.s8.bf16 %v629_v16 }
 0x167   : > { %2723 = vmatpush3.bf16.msra.mxu1 %v758_v24  ;;  %2730 = vmatprep.subr.bf16.mxu0 %v789_v25  ;;  %v829_v24 = vunpack.c.h.s8.bf16 %v637_v18  ;;  %v820_v25 = vunpack.c.l.s8.bf16 %v633_v11  ;;  %v3064_v18 = vld [vmem:[%s4083_s0 + $0x60] ss:$0 sps:$4 sm:$0xff]  }
 0x168   : > { %2752 = vmatprep.subr.bf16.mxu1 %v805_v27  ;;  %v632_v27 = vld [vmem:[%s3785_s21 + $0x2b0] sm:$0xff] }
 0x169   : > { %1220 = vmatmul.mubr.bf16.vlgmr.msra.gmra.mxu0 %v2460_v29  ;;  %v2469_v29 = vcombine.high %v3996_v21, %v3996_v21 }
 0x16a   : > { %1260 = vmatmul.mubr.bf16.vlgmr.msra.gmra.mxu1 %v2462_v30  ;;  %2731 = vmatpush3.bf16.msra.mxu0 %v781_v33  ;;  %v2471_v30 = vcombine.high %v4001_v22, %v4001_v22  ;;  %v819_v33 = vunpack.c.h.s8.bf16 %v632_v27 }
 0x16b   : > { %2753 = vmatpush3.bf16.msra.mxu1 %v797_v34  ;;  %2732 = vmatprep.subr.bf16.mxu0 %v788_v35  ;;  %v628_v34 = vld [vmem:[%s3785_s21 + $0x290] sm:$0xff]  ;;  %v835_v35 = vunpack.c.h.s8.bf16 %v640_v28 }
 0x16c   : > { %2754 = vmatprep.subr.bf16.mxu1 %v804_v36  ;;  %1299 = vmatprep.mubr.bf16.mxu0 %v2465_v39  ;;  %v636_v36 = vld [vmem:[%s3785_s21 + $0x2d0] sm:$0xff]  ;;  %v811_v37 = vunpack.c.h.s8.bf16 %v628_v34  ;;  %v818_v39 = vunpack.c.l.s8.bf16 %v632_v27 }
 0x16d   : > { %1339 = vmatprep.mubr.bf16.mxu1 %v2467_v40  ;;  %v827_v38 = vunpack.c.h.s8.bf16 %v636_v36  ;;  %v834_v40 = vunpack.c.l.s8.bf16 %v640_v28  ;;  %v826_v44 = vunpack.c.l.s8.bf16 %v636_v36 }
 0x16e   : > { %2733 = vmatpush3.bf16.msra.mxu0 %v780_v41  ;;  %v631_v41 = vld [vmem:[%s3785_s21 + $0x2a8] sm:$0xff] }
 0x16f   : > { %2755 = vmatpush3.bf16.msra.mxu1 %v796_v42  ;;  %2734 = vmatprep.subr.bf16.mxu0 %v787_v43  ;;  %v639_v42 = vld [vmem:[%s3785_s21 + $0x2e8] sm:$0xff]  ;;  %v810_v43 = vunpack.c.l.s8.bf16 %v628_v34  ;;  %v816_v51 = vunpack.c.l.s8.bf16 %v631_v41 }
 0x170   : > { %2756 = vmatprep.subr.bf16.mxu1 %v803_v45  ;;  %v817_v45 = vunpack.c.h.s8.bf16 %v631_v41  ;;  %v832_v52 = vunpack.c.l.s8.bf16 %v639_v42  ;;  %v3065_v41 = vld [vmem:[%s3799_s24 + $0xe0] ss:$16 sps:$4 sm:$0xff]  }
 0x172   : > { %2735 = vmatpush3.bf16.msra.mxu0 %v779_v47  ;;  %v833_v47 = vunpack.c.h.s8.bf16 %v639_v42  ;;  %v3067_v42 = vld [vmem:[%s3799_s24 + $0xe4] ss:$16 sps:$4 sm:$0xff]  }
 0x173   : > { %2757 = vmatpush3.bf16.msra.mxu1 %v795_v48  ;;  %2736 = vmatprep.subr.bf16.mxu0 %v786_v49  ;;  %v635_v48 = vld [vmem:[%s3785_s21 + $0x2c8] sm:$0xff]  ;;  %v809_v49 = vunpack.c.h.s8.bf16 %v627_v46 }
 0x174   : > { %2758 = vmatprep.subr.bf16.mxu1 %v802_v50  ;;  %v825_v50 = vunpack.c.h.s8.bf16 %v635_v48  ;;  %v824_v56 = vunpack.c.l.s8.bf16 %v635_v48  ;;  %v3071_v48 = vld [vmem:[%s3799_s24 + $0xc0] ss:$16 sps:$4 sm:$0xff]  }
 0x176   : > { %2737 = vmatpush3.bf16.msra.mxu0 %v778_v53  ;;  %v630_v53 = vld [vmem:[%s3785_s21 + $0x2a0] sm:$0xff] }
 0x177   : > { %2759 = vmatpush3.bf16.msra.mxu1 %v794_v54  ;;  %2738 = vmatprep.subr.bf16.mxu0 %v785_v55  ;;  %v638_v54 = vld [vmem:[%s3785_s21 + $0x2e0] sm:$0xff]  ;;  %v808_v55 = vunpack.c.l.s8.bf16 %v627_v46  ;;  %v814_v63 = vunpack.c.l.s8.bf16 %v630_v53  ;;  %v3073_v46 = vld [vmem:[%s3799_s24 + $0xc4] ss:$16 sps:$4 sm:$0xff]  }
 0x178   : > { %2760 = vmatprep.subr.bf16.mxu1 %v801_v57  ;;  %v815_v57 = vunpack.c.h.s8.bf16 %v630_v53  ;;  %v830_v0 = vunpack.c.l.s8.bf16 %v638_v54  ;;  %v3080_v53 = vld [vmem:[%s3799_s24 + $0xa8] ss:$16 sps:$4 sm:$0xff]  }
 0x17a   : > { %2739 = vmatpush3.bf16.msra.mxu0 %v777_v59  ;;  %v831_v59 = vunpack.c.h.s8.bf16 %v638_v54  ;;  %v3085_v54 = vld [vmem:[%s3799_s24 + $0x84] ss:$16 sps:$4 sm:$0xff]  }
 0x17b   : > { %2761 = vmatpush3.bf16.msra.mxu1 %v793_v60  ;;  %2740 = vmatprep.subr.bf16.mxu0 %v784_v61  ;;  %v634_v60 = vld [vmem:[%s3785_s21 + $0x2c0] sm:$0xff]  ;;  %v807_v61 = vunpack.c.h.s8.bf16 %v626_v58 }
 0x17c   : > { %2762 = vmatprep.subr.bf16.mxu1 %v800_v62  ;;  %v823_v62 = vunpack.c.h.s8.bf16 %v634_v60 }
 0x17e   : > { %2741 = vmatpush3.bf16.msra.mxu0 %v776_v1  ;;  %v806_v1 = vunpack.c.l.s8.bf16 %v626_v58  ;;  %v3091_v58 = vld [vmem:[%s3799_s24 + $0x64] ss:$16 sps:$4 sm:$0xff]  }
 0x17f   : > { %2763 = vmatpush3.bf16.msra.mxu1 %v792_v2  ;;  %2742 = vmatprep.subr.bf16.mxu0 %v783_v3  ;;  %v822_v2 = vunpack.c.l.s8.bf16 %v634_v60  ;;  %v645_v3 = vld [vmem:[%s3785_s21 + $0x318] sm:$0xff]  ;;  %v3089_v60 = vld [vmem:[%s3799_s24 + $0x60] ss:$16 sps:$4 sm:$0xff]  }
 0x180   : > { %2764 = vmatprep.subr.bf16.mxu1 %v799_v5  ;;  %v2470_v5 = vcombine.low %v4001_v22, %v4001_v22  ;;  %v845_v6 = vunpack.c.h.s8.bf16 %v645_v3 }
 0x182   : > { %2743 = vmatpush3.bf16.msra.mxu0 %v775_v7  ;;  %v3472_v7 = vmov 0.0  }
 0x183   : > { %2765 = vmatpush3.bf16.msra.mxu1 %v791_v8  ;;  %2744 = vmatprep.subr.bf16.mxu0 %v782_v9  ;;  %v844_v8 = vunpack.c.l.s8.bf16 %v645_v3  ;;  %v644_v9 = vld [vmem:[%s3785_s21 + $0x310] sm:$0xff] }
 0x184   : > { %2766 = vmatprep.subr.bf16.mxu1 %v798_v10  ;;  %v843_v10 = vunpack.c.h.s8.bf16 %v644_v9  ;;  %v842_v11 = vunpack.c.l.s8.bf16 %v644_v9  ;;  %v3104_v9 = vld [vmem:[%s3799_s24 + $0x28] ss:$16 sps:$4 sm:$0xff]  }
 0x186   : > { %2745 = vmatpush3.bf16.msra.mxu0 %v774_v13  ;;  %v841_v13 = vunpack.c.h.s8.bf16 %v643_v12 }
 0x187   : > { %2767 = vmatpush3.bf16.msra.mxu1 %v790_v14  ;;  %2774 = vmatprep.subr.bf16.mxu0 %v821_v15  ;;  %v840_v14 = vunpack.c.l.s8.bf16 %v643_v12  ;;  %v642_v15 = vld [vmem:[%s3785_s21 + $0x300] sm:$0xff]  ;;  %s4138_s21 = sld [smem:[#allocation30_spill]] (!%p2507_p9) }
 0x188   : > { %2796 = vmatprep.subr.bf16.mxu1 %v837_v17  ;;  %v839_v16 = vunpack.c.h.s8.bf16 %v642_v15  ;;  %v838_v17 = vunpack.c.l.s8.bf16 %v642_v15  ;;  %v3109_v15 = vld [vmem:[%s3799_s24 + $0x4] ss:$16 sps:$4 sm:$0xff]  }
 0x189   : > { %1300 = vmatmul.mubr.bf16.vlgmr.msra.gmra.mxu0 %v2464_v19 }
 0x18a   : > { %1340 = vmatmul.mubr.bf16.vlgmr.msra.gmra.mxu1 %v2466_v20  ;;  %2775 = vmatpush3.bf16.msra.mxu0 %v813_v23 }
 0x18b   : > { %2797 = vmatpush3.bf16.msra.mxu1 %v829_v24  ;;  %2776 = vmatprep.subr.bf16.mxu0 %v820_v25 }
 0x18c   : > { %2798 = vmatprep.subr.bf16.mxu1 %v836_v26  ;;  %1379 = vmatprep.mubr.bf16.mxu0 %v2469_v29 }
 0x18d   : > { %1419 = vmatprep.mubr.bf16.mxu1 %v2471_v30 }
 0x18e   : > { %2777 = vmatpush3.bf16.msra.mxu0 %v812_v31 }
 0x18f   : > { %2799 = vmatpush3.bf16.msra.mxu1 %v828_v32  ;;  %2778 = vmatprep.subr.bf16.mxu0 %v819_v33 }
 0x190   : > { %2800 = vmatprep.subr.bf16.mxu1 %v835_v35 }
 0x192   : > { %2779 = vmatpush3.bf16.msra.mxu0 %v811_v37 }
 0x193   : > { %2801 = vmatpush3.bf16.msra.mxu1 %v827_v38  ;;  %2780 = vmatprep.subr.bf16.mxu0 %v818_v39 }
 0x194   : > { %2802 = vmatprep.subr.bf16.mxu1 %v834_v40 }
 0x196   : > { %2781 = vmatpush3.bf16.msra.mxu0 %v810_v43  ;;  %v3068_v43 = vld [vmem:[%s3799_s24 + $0xe8] ss:$16 sps:$4 sm:$0xff]  }
 0x197   : > { %2803 = vmatpush3.bf16.msra.mxu1 %v826_v44  ;;  %2782 = vmatprep.subr.bf16.mxu0 %v817_v45  ;;  %v3070_v45 = vld [vmem:[%s3799_s24 + $0xec] ss:$16 sps:$4 sm:$0xff]  }
 0x198   : > { %2804 = vmatprep.subr.bf16.mxu1 %v833_v47  ;;  %v3076_v47 = vld [vmem:[%s3799_s24 + $0xcc] ss:$16 sps:$4 sm:$0xff]  }
 0x19a   : > { %2783 = vmatpush3.bf16.msra.mxu0 %v809_v49  ;;  %v3074_v49 = vld [vmem:[%s3799_s24 + $0xc8] ss:$16 sps:$4 sm:$0xff]  }
 0x19b   : > { %2805 = vmatpush3.bf16.msra.mxu1 %v825_v50  ;;  %2784 = vmatprep.subr.bf16.mxu0 %v816_v51  ;;  %v3079_v50 = vld [vmem:[%s3799_s24 + $0xa4] ss:$16 sps:$4 sm:$0xff]   ;;  %v3082_v51 = vld [vmem:[%s3799_s24 + $0xac] ss:$16 sps:$4 sm:$0xff]  }
 0x19c   : > { %2806 = vmatprep.subr.bf16.mxu1 %v832_v52  ;;  %v3077_v52 = vld [vmem:[%s3799_s24 + $0xa0] ss:$16 sps:$4 sm:$0xff]  }
 0x19e   : > { %2785 = vmatpush3.bf16.msra.mxu0 %v808_v55  ;;  %v3088_v55 = vld [vmem:[%s3799_s24 + $0x8c] ss:$16 sps:$4 sm:$0xff]  }
 0x19f   : > { %2807 = vmatpush3.bf16.msra.mxu1 %v824_v56  ;;  %2786 = vmatprep.subr.bf16.mxu0 %v815_v57  ;;  %v3083_v56 = vld [vmem:[%s3799_s24 + $0x80] ss:$16 sps:$4 sm:$0xff]   ;;  %v3086_v57 = vld [vmem:[%s3799_s24 + $0x88] ss:$16 sps:$4 sm:$0xff]  }
 0x1a0   : > { %2808 = vmatprep.subr.bf16.mxu1 %v831_v59  ;;  %v3094_v59 = vld [vmem:[%s3799_s24 + $0x6c] ss:$16 sps:$4 sm:$0xff]  }
 0x1a2   : > { %2787 = vmatpush3.bf16.msra.mxu0 %v807_v61  ;;  %v3092_v61 = vld [vmem:[%s3799_s24 + $0x68] ss:$16 sps:$4 sm:$0xff]  }
 0x1a3   : > { %2809 = vmatpush3.bf16.msra.mxu1 %v823_v62  ;;  %2788 = vmatprep.subr.bf16.mxu0 %v814_v63  ;;  %v3097_v62 = vld [vmem:[%s3799_s24 + $0x44] ss:$16 sps:$4 sm:$0xff]   ;;  %v3100_v63 = vld [vmem:[%s3799_s24 + $0x4c] ss:$16 sps:$4 sm:$0xff]  }
 0x1a4   : > { %2810 = vmatprep.subr.bf16.mxu1 %v830_v0  ;;  %v3095_v0 = vld [vmem:[%s3799_s24 + $0x40] ss:$16 sps:$4 sm:$0xff]  }
 0x1a6   : > { %2789 = vmatpush3.bf16.msra.mxu0 %v806_v1  ;;  %v3098_v1 = vld [vmem:[%s3799_s24 + $0x48] ss:$16 sps:$4 sm:$0xff]  }
 0x1a7   : > { %2811 = vmatpush3.bf16.msra.mxu1 %v822_v2  ;;  %2880 = vmatprep.subr.bf16.mxu0 %v3472_v7 }
 0x1a8   : > { %1681 = vmatprep.subr.bf16.mxu1 %v3067_v42 }
 0x1a9   : > { %1380 = vmatmul.mubr.bf16.vlgmr.msra.gmra.mxu0 %v2468_v4  ;;  %v3103_v4 = vld [vmem:[%s3799_s24 + $0x24] ss:$16 sps:$4 sm:$0xff]  }
 0x1aa   : > { %1420 = vmatmul.mubr.bf16.vlgmr.msra.gmra.mxu1 %v2470_v5  ;;  %2881 = vmatpush3.bf16.msra.mxu0 %v845_v6  ;;  %v3106_v5 = vld [vmem:[%s3799_s24 + $0x2c] ss:$16 sps:$4 sm:$0xff]  }
 0x1ab   : > { %2896 = vmatprep.mubr.msk.bf16.mxu0 %vm3473_vm0, %v3472_v7  ;;  %2882 = vmatprep.subr.bf16.mxu0 %v3472_v7 }
 0x1ac   : > { %1682 = vmatpush1.bf16.msra.mxu1 %v3065_v41 }
 0x1ad   : > { %1683 = vmatprep.subr.bf16.mxu1 %v3073_v46 }
 0x1ae   : > { %2883 = vmatpush3.bf16.msra.mxu0 %v844_v8  ;;  %v3101_v8 = vld [vmem:[%s3799_s24 + $0x20] ss:$16 sps:$4 sm:$0xff]  }
 0x1af   : > { %2884 = vmatprep.subr.bf16.mxu0 %v3472_v7 }
 0x1b0   : > { %1684 = vmatpush1.bf16.msra.mxu1 %v3071_v48 }
 0x1b1   : > { %1685 = vmatprep.subr.bf16.mxu1 %v3079_v50 }
 0x1b2   : > { %2885 = vmatpush3.bf16.msra.mxu0 %v843_v10 }
 0x1b3   : > { %2886 = vmatprep.subr.bf16.mxu0 %v3472_v7 }
 0x1b4   : > { %1686 = vmatpush1.bf16.msra.mxu1 %v3077_v52 }
 0x1b5   : > { %1687 = vmatprep.subr.bf16.mxu1 %v3085_v54 }
 0x1b6   : > { %2887 = vmatpush3.bf16.msra.mxu0 %v842_v11 }
 0x1b7   : > { %2888 = vmatprep.subr.bf16.mxu0 %v3472_v7 }
 0x1b8   : > { %1688 = vmatpush1.bf16.msra.mxu1 %v3083_v56 }
 0x1b9   : > { %1689 = vmatprep.subr.bf16.mxu1 %v3091_v58 }
 0x1ba   : > { %2889 = vmatpush3.bf16.msra.mxu0 %v841_v13 }
 0x1bb   : > { %2890 = vmatprep.subr.bf16.mxu0 %v3472_v7 }
 0x1bc   : > { %1690 = vmatpush1.bf16.msra.mxu1 %v3089_v60  ;;  %v2473_v60 = vld [vmem:[%s454_s22] ss:$0 sm:$0xff] }
 0x1bd   : > { %1691 = vmatprep.subr.bf16.mxu1 %v3097_v62  ;;  %v2474_v62 = vld [vmem:[%s462_s30] ss:$0 sm:$0xff] }
 0x1be   : > { %2891 = vmatpush3.bf16.msra.mxu0 %v840_v14 }
 0x1bf   : > { %2892 = vmatprep.subr.bf16.mxu0 %v3472_v7 }
 0x1c0   : > { %1692 = vmatpush1.bf16.msra.mxu1 %v3095_v0 }
 0x1c1   : > { %1693 = vmatprep.subr.bf16.mxu1 %v3103_v4 }
 0x1c2   : > { %2893 = vmatpush3.bf16.msra.mxu0 %v839_v16  ;;  %v3112_v16 = vld [vmem:[%s3799_s24 + $0xc] ss:$16 sps:$4 sm:$0xff]  }
 0x1c3   : > { %2894 = vmatprep.subr.bf16.mxu0 %v3472_v7 }
 0x1c4   : > { %1694 = vmatpush1.bf16.msra.mxu1 %v3101_v8 }
 0x1c5   : > { %1695 = vmatprep.subr.bf16.mxu1 %v3109_v15 }
 0x1c6   : > { %2895 = vmatpush3.bf16.msra.mxu0 %v838_v17 }
 0x1c7   : > { %1722 = vmatprep.subr.bf16.mxu0 %v3070_v45 }
 0x1c9   : > { %v2570_v19 = vpop.f32.mrf.mxu0  ;;  %2897 = vmatmul.mubr.bf16.vlgmr.msra.gmra.mxu0 %v3064_v18 }
 0x1ca   : > { %v2592_v20 = vpop.f32.mrf.mxu1  ;;  %1723 = vmatpush1.bf16.msra.mxu0 %v3068_v43 }
 0x1cb   : > { %v2571_v21 = vpop.f32.mrf.mxu0  ;;  %1724 = vmatprep.subr.bf16.mxu0 %v3076_v47 }
 0x1cc   : > { %v2593_v22 = vpop.f32.mrf.mxu1  ;;  %v2572_v23 = vadd.f32 %v2571_v21, %v2570_v19  ;;  %v3107_v19 = vld [vmem:[%s3799_s24] ss:$16 sps:$4 sm:$0xff]  }
 0x1cd   : > { %v2594_v24 = vadd.f32 %v2593_v22, %v2592_v20  ;;  %v2573_v25 = vpop.f32.mrf.mxu0  ;;  %v3110_v20 = vld [vmem:[%s3799_s24 + $0x8] ss:$16 sps:$4 sm:$0xff]   ;;  %1696 = vmatpush1.bf16.msra.mxu1 %v3107_v19  ;;  %v3474_v22 = vmov 0  }
 0x1ce   : > { %v2595_v26 = vpop.f32.mrf.mxu1  ;;  %1725 = vmatpush1.bf16.msra.mxu0 %v3074_v49  ;;  %1713 = vmatprep.mubr.bf16.mxu1 %v3474_v22 }
 0x1cf   : > { %v1022_v27 = vadd.f32 %v2594_v24, %v2572_v23  ;;  %v2574_v28 = vpop.f32.mrf.mxu0  ;;  %1726 = vmatprep.subr.bf16.mxu0 %v3082_v51  ;;  %1754 = vmatprep.mubr.bf16.mxu0 %v3474_v22 }
 0x1d0   : > { %v2596_v29 = vpop.f32.mrf.mxu1 }
 0x1d2   : > { %1727 = vmatpush1.bf16.msra.mxu0 %v3080_v53 }
 0x1d3   : > { %1728 = vmatprep.subr.bf16.mxu0 %v3088_v55 }
 0x1d6   : > { %1729 = vmatpush1.bf16.msra.mxu0 %v3086_v57 }
 0x1d7   : > { %1730 = vmatprep.subr.bf16.mxu0 %v3094_v59 }
 0x1da   : > { %1731 = vmatpush1.bf16.msra.mxu0 %v3092_v61 }
 0x1db   : > { %1732 = vmatprep.subr.bf16.mxu0 %v3100_v63 }
 0x1de   : > { %1733 = vmatpush1.bf16.msra.mxu0 %v3098_v1 }
 0x1df   : > { %1734 = vmatprep.subr.bf16.mxu0 %v3106_v5 }
 0x1e2   : > { %1735 = vmatpush1.bf16.msra.mxu0 %v3104_v9 }
 0x1e3   : > { %1736 = vmatprep.subr.bf16.mxu0 %v3112_v16 }
 0x1e6   : > { %1737 = vmatpush1.bf16.msra.mxu0 %v3110_v20 }
 0x1e9   : > { %v2614_v30 = vpop.f32.mrf.mxu0 }
 0x1ea   : > { %v2636_v31 = vpop.f32.mrf.mxu1 }
 0x1eb   : > { %v2615_v32 = vpop.f32.mrf.mxu0 }
 0x1ec   : > { %v2637_v33 = vpop.f32.mrf.mxu1  ;;  %v2616_v34 = vadd.f32 %v2615_v32, %v2614_v30 }
 0x1ed   : > { %v2638_v35 = vadd.f32 %v2637_v33, %v2636_v31  ;;  %v2617_v36 = vpop.f32.mrf.mxu0 }
 0x1ee   : > { %v2639_v37 = vpop.f32.mrf.mxu1  ;;  %v1062_v38 = vadd.f32 %v2616_v34, %v1022_v27 }
 0x1ef   : > { %v2618_v39 = vpop.f32.mrf.mxu0 }
 0x1f0   : > { %v2640_v40 = vpop.f32.mrf.mxu1  ;;  %v1102_v44 = vadd.f32 %v2638_v35, %v1062_v38 }
 0x209   : > { %v2658_v2 = vpop.f32.mrf.mxu0 }
 0x20a   : > { %v2680_v3 = vpop.f32.mrf.mxu1 }
 0x20b   : > { %v2659_v6 = vpop.f32.mrf.mxu0 }
 0x20c   : > { %v2681_v7 = vpop.f32.mrf.mxu1  ;;  %v2660_v10 = vadd.f32 %v2659_v6, %v2658_v2  ;;  %v1484_v6 = vld [vmem:[#allocation2 + $0x10] sm:$0xff] }
 0x20d   : > { %v2682_v11 = vadd.f32 %v2681_v7, %v2680_v3  ;;  %v2661_v12 = vpop.f32.mrf.mxu0  ;;  %v1486_v7 = vld [vmem:[#allocation2 + $0x18] sm:$0xff] }
 0x20e   : > { %v2683_v13 = vpop.f32.mrf.mxu1  ;;  %v1142_v14 = vadd.f32 %v2660_v10, %v1102_v44  ;;  %v1485_v10 = vld [vmem:[#allocation2] sm:$0xff] }
 0x20f   : > { %v2662_v17 = vpop.f32.mrf.mxu0 }
 0x210   : > { %v2684_v18 = vpop.f32.mrf.mxu1  ;;  %v1182_v21 = vadd.f32 %v2682_v11, %v1142_v14  ;;  %v1487_v11 = vld [vmem:[#allocation2 + $0x8] sm:$0xff] }
 0x229   : > { %v2702_v23 = vpop.f32.mrf.mxu0 }
 0x22a   : > { %v2724_v24 = vpop.f32.mrf.mxu1 }
 0x22b   : > { %v2703_v25 = vpop.f32.mrf.mxu0 }
 0x22c   : > { %v2725_v26 = vpop.f32.mrf.mxu1  ;;  %v2704_v27 = vadd.f32 %v2703_v25, %v2702_v23 }
 0x22d   : > { %v2726_v28 = vadd.f32 %v2725_v26, %v2724_v24  ;;  %v2705_v29 = vpop.f32.mrf.mxu0 }
 0x22e   : > { %v2727_v30 = vpop.f32.mrf.mxu1  ;;  %v1222_v31 = vadd.f32 %v2704_v27, %v1182_v21 }
 0x22f   : > { %v2706_v32 = vpop.f32.mrf.mxu0 }
 0x230   : > { %v2728_v33 = vpop.f32.mrf.mxu1  ;;  %v1262_v34 = vadd.f32 %v2726_v28, %v1222_v31 }
 0x249   : > { %v2746_v35 = vpop.f32.mrf.mxu0 }
 0x24a   : > { %v2768_v36 = vpop.f32.mrf.mxu1 }
 0x24b   : > { %v2747_v37 = vpop.f32.mrf.mxu0 }
 0x24c   : > { %v2769_v38 = vpop.f32.mrf.mxu1  ;;  %v2748_v51 = vadd.f32 %v2747_v37, %v2746_v35 }
 0x24d   : > { %v2749_v39 = vpop.f32.mrf.mxu0  ;;  %v2770_v53 = vadd.f32 %v2769_v38, %v2768_v36 }
 0x24e   : > { %v2771_v40 = vpop.f32.mrf.mxu1  ;;  %v1302_v52 = vadd.f32 %v2748_v51, %v1262_v34 }
 0x24f   : > { %v2750_v41 = vpop.f32.mrf.mxu0 }
 0x250   : > { %v2772_v42 = vpop.f32.mrf.mxu1  ;;  %v1342_v55 = vadd.f32 %v2770_v53, %v1302_v52 }
 0x269   : > { %v2790_v43 = vpop.f32.mrf.mxu0 }
 0x26a   : > { %v2812_v44 = vpop.f32.mrf.mxu1 }
 0x26b   : > { %v2791_v45 = vpop.f32.mrf.mxu0 }
 0x26c   : > { %v2813_v46 = vpop.f32.mrf.mxu1  ;;  %v2792_v54 = vadd.f32 %v2791_v45, %v2790_v43 }
 0x26d   : > { %v2793_v47 = vpop.f32.mrf.mxu0  ;;  %v2814_v57 = vadd.f32 %v2813_v46, %v2812_v44 }
 0x26e   : > { %v2815_v48 = vpop.f32.mrf.mxu1  ;;  %v1382_v56 = vadd.f32 %v2792_v54, %v1342_v55 }
 0x26f   : > { %v2794_v49 = vpop.f32.mrf.mxu0 }
 0x270   : > { %v2816_v50 = vpop.f32.mrf.mxu1  ;;  %v1422_v58 = vadd.f32 %v2814_v57, %v1382_v56 }
 0x289   : > { %v1461_v59 = vpop.f32.mrf.mxu0 }
 0x28a   : > { %v1462_v61 = vadd.f32 %v1461_v59, %v1422_v58 }
 0x28b   : > { %v2898_v63 = vpop.f32.mrf.mxu0 }
 0x28c   : > { %v1474_v0 = vmul.f32 %v2473_v60, %v1462_v61 }
 0x28d   : > { %v1464_v1 = vpop.f32.mrf.mxu0 }
 0x28e   : > { %v1482_v2 = vadd.f32 %v2474_v62, %v1474_v0 }
 0x28f   : > { %v2899_v3 = vpop.f32.mrf.mxu0 }
 0x290   : > { %v1483_v4 = vmax.f32 %v1482_v2, 0.0 }
 0x292   : > { %v1488_v5 = vpack.c.bf16 %v1483_v4, %v1483_v4 }
 0x294   : > { %1714 = vmatmul.mubr.bf16.vlgmr.msra.gmra.mxu1 %v1488_v5  ;;  %1755 = vmatmul.mubr.bf16.vlgmr.msra.gmra.mxu0 %v1488_v5 }
 0x354   : > { %v1715_v8 = vpop.f32.mrf.mxu1  ;;  %v1756_v9 = vpop.f32.mrf.mxu0 }
 0x355   : > { %v1763_v12 = vadd.f32 %v1715_v8, %v1484_v6  ;;  %v1765_v13 = vadd.f32 %v1756_v9, %v1486_v7 }
 0x356   : > { %v1717_v14 = vpop.f32.mrf.mxu1  ;;  %v1758_v15 = vpop.f32.mrf.mxu0  ;;  %1774 = sbr.rel (%p2507_p9) target bundleno = 1604 (0x644), region = 104 }
 0x357   : > { %1767 = vst [vmem:[#allocation2 + $0x10] sm:$0xff] %v1763_v12  ;;  %1769 = vst [vmem:[#allocation2 + $0x18] sm:$0xff] %v1765_v13  ;;  %v1764_v16 = vadd.f32 %v1717_v14, %v1485_v10  ;;  %v1766_v17 = vadd.f32 %v1758_v15, %v1487_v11 }
 0x358   : > { %v1719_v18 = vpop.f32.mrf.mxu1  ;;  %v1760_v19 = vpop.f32.mrf.mxu0 }
 0x359   : > { %1768 = vst [vmem:[#allocation2] sm:$0xff] %v1764_v16  ;;  %1770 = vst [vmem:[#allocation2 + $0x8] sm:$0xff] %v1766_v17 }
 0x35a   : > { %v1720_v20 = vpop.f32.mrf.mxu1  ;;  %v1761_v21 = vpop.f32.mrf.mxu0 }
 0x35b   : > { %v3113_v22 = vld [vmem:[#allocation11 + $0x78] sm:$0xff]   ;;  %v3117_v26 = vld [vmem:[#allocation11 + $0x70] sm:$0xff]   ;;  %v3121_v30 = vld [vmem:[#allocation11 + $0x68] sm:$0xff]   ;;  %v1781_v41 = vlaneseq  ;;  %v3475_v5 = vmov 0.0   ;;  %vm3476_vm1 = vmmov 0  }
 0x35c   : > { %v3114_v23 = vld [vmem:[#allocation11 + $0xf8] sm:$0xff]   ;;  %2827 = vmatprep.subr.bf16.mxu0 %v3113_v22  ;;  %v3118_v27 = vld [vmem:[#allocation11 + $0xf0] sm:$0xff]   ;;  %v3122_v31 = vld [vmem:[#allocation11 + $0xe8] sm:$0xff]  }
 0x35d   : > { %v3115_v24 = vld [vmem:[#allocation11 + $0x38] sm:$0xff]   ;;  %2849 = vmatprep.subr.bf16.mxu1 %v3114_v23  ;;  %v3119_v28 = vld [vmem:[#allocation11 + $0x30] sm:$0xff]   ;;  %v3123_v32 = vld [vmem:[#allocation11 + $0x28] sm:$0xff]   ;;  %v1782_v46 = vshrl.u32 %v1781_v41, 7 }
 0x35e   : > { %v3116_v25 = vld [vmem:[#allocation11 + $0xb8] sm:$0xff]   ;;  %2828 = vmatpush3.bf16.msra.mxu0 %v3115_v24  ;;  %v3120_v29 = vld [vmem:[#allocation11 + $0xb0] sm:$0xff]   ;;  %v3124_v33 = vld [vmem:[#allocation11 + $0xa8] sm:$0xff]  }
 0x35f   : > { %2850 = vmatpush3.bf16.msra.mxu1 %v3116_v25  ;;  %2829 = vmatprep.subr.bf16.mxu0 %v3117_v26  ;;  %v3125_v34 = vld [vmem:[#allocation11 + $0x60] sm:$0xff]   ;;  %v3129_v38 = vld [vmem:[#allocation11 + $0x58] sm:$0xff]   ;;  %v3133_v43 = vld [vmem:[#allocation11 + $0x50] sm:$0xff]   ;;  %v1787_v51 = vsub.s32 1, %v1782_v46  ;;  %v1795_v53 = vsub.s32 3, %v1782_v46  ;;  %v1783_v55 = vsub.s32 0, %v1782_v46 }
 0x360   : > { %2851 = vmatprep.subr.bf16.mxu1 %v3118_v27  ;;  %v3126_v35 = vld [vmem:[#allocation11 + $0xe0] sm:$0xff]   ;;  %v3130_v39 = vld [vmem:[#allocation11 + $0xd8] sm:$0xff]   ;;  %v3134_v44 = vld [vmem:[#allocation11 + $0xd0] sm:$0xff]   ;;  %v1791_v57 = vsub.s32 2, %v1782_v46 }
 0x361   : > { %v3127_v36 = vld [vmem:[#allocation11 + $0x20] sm:$0xff]   ;;  %v3131_v40 = vld [vmem:[#allocation11 + $0x18] sm:$0xff]   ;;  %v3135_v45 = vld [vmem:[#allocation11 + $0x10] sm:$0xff]  }
 0x362   : > { %2830 = vmatpush3.bf16.msra.mxu0 %v3119_v28  ;;  %v3128_v37 = vld [vmem:[#allocation11 + $0xa0] sm:$0xff]   ;;  %v3132_v42 = vld [vmem:[#allocation11 + $0x98] sm:$0xff]   ;;  %v3136_v47 = vld [vmem:[#allocation11 + $0x90] sm:$0xff]  }
 0x363   : > { %2852 = vmatpush3.bf16.msra.mxu1 %v3120_v29  ;;  %2831 = vmatprep.subr.bf16.mxu0 %v3121_v30  ;;  %v3137_v48 = vld [vmem:[#allocation11 + $0x48] sm:$0xff]   ;;  %v3141_v54 = vld [vmem:[#allocation11 + $0x40] sm:$0xff]   ;;  %v1776_v60 = vld [vmem:[#allocation2] sm:$0xff] }
 0x364   : > { %2853 = vmatprep.subr.bf16.mxu1 %v3122_v31  ;;  %v3138_v49 = vld [vmem:[#allocation11 + $0xc8] sm:$0xff]   ;;  %v3142_v56 = vld [vmem:[#allocation11 + $0xc0] sm:$0xff]   ;;  %v1779_v61 = vld [vmem:[#allocation10] sm:$0xf] }
 0x365   : > { %v3139_v50 = vld [vmem:[#allocation11 + $0x8] sm:$0xff]   ;;  %v3143_v58 = vld [vmem:[#allocation11] sm:$0xff]   ;;  %v1788_v63 = vrot.slane %v1779_v61, %v1787_v51  ;;  %v1796_v0 = vrot.slane %v1779_v61, %v1795_v53  ;;  %v1784_v2 = vrot.slane %v1779_v61, %v1783_v55  ;;  %v1777_v3 = vld [vmem:[#allocation2 + $0x18] sm:$0xff]  ;;  %v1792_v4 = vrot.slane %v1779_v61, %v1791_v57 }
 0x366   : > { %2832 = vmatpush3.bf16.msra.mxu0 %v3123_v32  ;;  %v3140_v52 = vld [vmem:[#allocation11 + $0x88] sm:$0xff]   ;;  %v3144_v59 = vld [vmem:[#allocation11 + $0x80] sm:$0xff]   ;;  %v3146_v19 = vld [vmem:[#allocation14 + $0x30] sm:$0xff]  }
 0x367   : > { %2854 = vmatpush3.bf16.msra.mxu1 %v3124_v33  ;;  %2833 = vmatprep.subr.bf16.mxu0 %v3125_v34  ;;  %v1778_v62 = vld [vmem:[#allocation2 + $0x8] sm:$0xff]  ;;  %v1775_v1 = vld [vmem:[#allocation2 + $0x10] sm:$0xff]  ;;  %v1802_v6 = vadd.f32 %v1788_v63, %v1776_v60  ;;  %v1803_v9 = vadd.f32 %v1792_v4, %v1777_v3  ;;  %v3150_v23 = vld [vmem:[#allocation14 + $0x10] sm:$0xff]  }
 0x368   : > { %2855 = vmatprep.subr.bf16.mxu1 %v3126_v35  ;;  %v1804_v7 = vadd.f32 %v1796_v0, %v1778_v62  ;;  %v1801_v8 = vadd.f32 %v1784_v2, %v1775_v1  ;;  %v3145_v18 = vld [vmem:[#allocation14 + $0x38] sm:$0xff]   ;;  %v3147_v20 = vld [vmem:[#allocation14 + $0x28] sm:$0xff]   ;;  %v3148_v21 = vld [vmem:[#allocation14 + $0x20] sm:$0xff]  }
 0x369   : > { %v1806_v10 = vmax.f32 %v1802_v6, 0.0  ;;  %v1807_v13 = vmax.f32 %v1803_v9, 0.0  ;;  %v3149_v22 = vld [vmem:[#allocation14 + $0x18] sm:$0xff]   ;;  %v3151_v24 = vld [vmem:[#allocation14 + $0x8] sm:$0xff]   ;;  %v3152_v25 = vld [vmem:[#allocation14] sm:$0xff]  }
 0x36a   : > { %2834 = vmatpush3.bf16.msra.mxu0 %v3127_v36  ;;  %v1808_v11 = vmax.f32 %v1804_v7, 0.0  ;;  %v1805_v12 = vmax.f32 %v1801_v8, 0.0  ;;  %v2508_v28 = vld [vmem:[#allocation13] ss:$0 sm:$0xff]  ;;  %v2541_v41 = vld [vmem:[#allocation16] ss:$0 sm:$0xff] }
 0x36b   : > { %2856 = vmatpush3.bf16.msra.mxu1 %v3128_v37  ;;  %2835 = vmatprep.subr.bf16.mxu0 %v3129_v38  ;;  %v1810_v14 = vpack.c.bf16 %v1806_v10, %v1806_v10  ;;  %v1811_v17 = vpack.c.bf16 %v1807_v13, %v1807_v13 }
 0x36c   : > { %2857 = vmatprep.subr.bf16.mxu1 %v3130_v39  ;;  %v1812_v15 = vpack.c.bf16 %v1808_v11, %v1808_v11  ;;  %v1809_v16 = vpack.c.bf16 %v1805_v12, %v1805_v12 }
 0x36d   : > { %2108 = vmatprep.mubr.bf16.mxu0 %v1810_v14 }
 0x36e   : > { %2836 = vmatpush3.bf16.msra.mxu0 %v3131_v40  ;;  %2148 = vmatprep.mubr.bf16.mxu1 %v1812_v15 }
 0x36f   : > { %2858 = vmatpush3.bf16.msra.mxu1 %v3132_v42  ;;  %2837 = vmatprep.subr.bf16.mxu0 %v3133_v43 }
 0x370   : > { %2859 = vmatprep.subr.bf16.mxu1 %v3134_v44 }
 0x372   : > { %2838 = vmatpush3.bf16.msra.mxu0 %v3135_v45 }
 0x373   : > { %2860 = vmatpush3.bf16.msra.mxu1 %v3136_v47  ;;  %2839 = vmatprep.subr.bf16.mxu0 %v3137_v48 }
 0x374   : > { %2861 = vmatprep.subr.bf16.mxu1 %v3138_v49 }
 0x376   : > { %2840 = vmatpush3.bf16.msra.mxu0 %v3139_v50 }
 0x377   : > { %2862 = vmatpush3.bf16.msra.mxu1 %v3140_v52  ;;  %2841 = vmatprep.subr.bf16.mxu0 %v3141_v54 }
 0x378   : > { %2863 = vmatprep.subr.bf16.mxu1 %v3142_v56 }
 0x37a   : > { %2842 = vmatpush3.bf16.msra.mxu0 %v3143_v58 }
 0x37b   : > { %2864 = vmatpush3.bf16.msra.mxu1 %v3144_v59  ;;  %2900 = vmatprep.subr.bf16.mxu0 %v3475_v5 }
 0x37d   : > { %2109 = vmatmul.mubr.bf16.vlgmr.msra.gmra.mxu0 %v1809_v16 }
 0x37e   : > { %2149 = vmatmul.mubr.bf16.vlgmr.msra.gmra.mxu1 %v1811_v17  ;;  %2901 = vmatpush3.bf16.msra.mxu0 %v3145_v18 }
 0x37f   : > { %2902 = vmatprep.subr.bf16.mxu0 %v3475_v5  ;;  %2916 = vmatprep.mubr.msk.bf16.mxu0 %vm3476_vm1, %v3475_v5 }
 0x382   : > { %2903 = vmatpush3.bf16.msra.mxu0 %v3146_v19 }
 0x383   : > { %2904 = vmatprep.subr.bf16.mxu0 %v3475_v5 }
 0x386   : > { %2905 = vmatpush3.bf16.msra.mxu0 %v3147_v20 }
 0x387   : > { %2906 = vmatprep.subr.bf16.mxu0 %v3475_v5 }
 0x38a   : > { %2907 = vmatpush3.bf16.msra.mxu0 %v3148_v21 }
 0x38b   : > { %2908 = vmatprep.subr.bf16.mxu0 %v3475_v5 }
 0x38e   : > { %2909 = vmatpush3.bf16.msra.mxu0 %v3149_v22 }
 0x38f   : > { %2910 = vmatprep.subr.bf16.mxu0 %v3475_v5 }
 0x392   : > { %2911 = vmatpush3.bf16.msra.mxu0 %v3150_v23 }
 0x393   : > { %2912 = vmatprep.subr.bf16.mxu0 %v3475_v5 }
 0x396   : > { %2913 = vmatpush3.bf16.msra.mxu0 %v3151_v24 }
 0x397   : > { %2914 = vmatprep.subr.bf16.mxu0 %v3475_v5 }
 0x39a   : > { %2915 = vmatpush3.bf16.msra.mxu0 %v3152_v25 }
 0x43d   : > { %v2843_v26 = vpop.f32.mrf.mxu0 }
 0x43e   : > { %v2865_v27 = vpop.f32.mrf.mxu1 }
 0x43f   : > { %v2844_v29 = vpop.f32.mrf.mxu0 }
 0x440   : > { %v2866_v30 = vpop.f32.mrf.mxu1  ;;  %v2845_v31 = vadd.f32 %v2844_v29, %v2843_v26 }
 0x441   : > { %v2846_v32 = vpop.f32.mrf.mxu0  ;;  %v2867_v35 = vadd.f32 %v2866_v30, %v2865_v27 }
 0x442   : > { %v2868_v33 = vpop.f32.mrf.mxu1  ;;  %v2111_v34 = vadd.f32 %v2845_v31, %v2508_v28 }
 0x443   : > { %v2847_v36 = vpop.f32.mrf.mxu0 }
 0x444   : > { %v2869_v37 = vpop.f32.mrf.mxu1  ;;  %v2151_v38 = vadd.f32 %v2867_v35, %v2111_v34 }
 0x446   : > { %v2156_v39 = vmax.f32 %v2151_v38, 0.0 }
 0x448   : > { %v2157_v40 = vpack.c.bf16 %v2156_v39, %v2156_v39 }
 0x44a   : > { %2917 = vmatmul.mubr.bf16.vlgmr.msra.gmra.mxu0 %v2157_v40 }
 0x50a   : > { %v2263_v42 = vpop.f32.mrf.mxu0 }
 0x50b   : > { %v2264_v43 = vadd.f32 %v2541_v41, %v2263_v42 }
 0x50c   : > { %v2918_v44 = vpop.f32.mrf.mxu0 }
 0x50d   : > { %2269 = vmax.xlane.f32.xlu0 %v2264_v43 }
 0x50e   : > { %v2266_v45 = vpop.f32.mrf.mxu0 }
 0x510   : > { %v2919_v46 = vpop.f32.mrf.mxu0 }
 0x596   : > { %v2270_v47 = vpop.xlane.xlu0 %2269 }
 0x597   : > { %v2271_v48 = vsub.f32 %v2264_v43, %v2270_v47 }
 0x599   : > { %v2272_v49 = vmul.f32 1.442695, %v2271_v48 }
 0x59b   : > { %3153 = vpow2.f32 %v2272_v49 }
 0x5a8   : > { %v3154_v50 = vpop.eup %3153 }
 0x5a9   : > { %2274 = vadd.xlane.f32.xlu0 %v3154_v50 }
 0x632   : > { %v2275_v51 = vpop.xlane.xlu0 %2274 }
 0x633   : > { %3155 = vrcp.f32 %v2275_v51 }
 0x640   : > { %v3156_v52 = vpop.eup %3155 }
 0x641   : > { %v2277_v53 = vmul.f32 %v3156_v52, %v3154_v50 }
 0x643   : > { %2278 = vst [vmem:[%s4138_s21] sm:$0xff] %v2277_v53 }
 0x644 PF: > { %s4139_s16 = sld [smem:[#allocation24_spill]]  ;;  %s4142_s13 = smov %s3445_s14 }
 0x645   : > { %s4140_s22 = sld [smem:[#allocation23_spill]] }
 0x646   : > { %s4141_s15 = sld [smem:[#allocation25_spill]] }
 0x64a   : > { %p28_p13 = scmp.ge.s32.totalorder %s4139_s16, 10  }
 0x64b   : > { %s4143_s14 = smov %s4140_s22 }
 0x64c   :  { %30 = sbr.rel (!%p28_p13) target bundleno = 15 (0xf), region = 161 }
 0x651   :  { %2290 = vsyncpa [#allocation4], 1 }
 0x652   :  { %2292 = vsyncpa [#allocation4 + $0x1], 1 }
 0x653   :  { %2293 = vsyncpa [#allocation6], 1 }
 0x654   :  { %2295 = vsyncpa [#allocation6 + $0x1], 1 }
 0x655   :  { %2296 = vsyncpa [#allocation9], 1 }
 0x656   :  { %2298 = vsyncpa [#allocation9 + $0x1], 1 }
 0x657   :  { %2299 = vsyncpa [#allocation12], 1 }
 0x658   :  { %2300 = vsyncpa [#allocation15], 1 }

</bundles_post_ra>
